<compile_context>
chip_gen: v5e
topology: v5e:2x2
jax: 0.10.0
libtpu: 0.0.40
codegen_flags: <defaults>
</compile_context>

<pallas_src>
import jax
import jax.numpy as jnp
from jax.experimental import pallas as pl
from jax.experimental.pallas import tpu as pltpu


# ------------------------------------------------------------------ hardware-aware knobs
def _tpu_vmem_capacity_bytes():
    """Physical VMEM per core; falls back to the v7x 64 MiB floor if the query fails."""
    try:
        return int(getattr(pltpu.get_tpu_info(), "vmem_capacity_bytes", 64 * 1024 * 1024))
    except Exception:
        return 64 * 1024 * 1024


def _vmem_limit_bytes(cap):
    # Leave headroom for Mosaic-internal scratch; never ask for more than ~100 MiB.
    return int(min(100 * 1024 * 1024, (cap * 3) // 4))


def _tile(dim, target, align):
    """Largest tile <= target that is a multiple of `align` and divides dim; else full dim."""
    if dim <= target:
        return dim
    t = (target // align) * align
    while t >= align:
        if dim % t == 0:
            return t
        t -= align
    return dim


# ------------------------------------------------------------------ tiled Linear (x @ W_t + b)
def linear_kernel(x_ref, w_ref, b_ref, o_ref, acc_ref):
    # K-tiled matmul with an f32 accumulator; bias added and result cast once at the last K step.
    # x/w are bf16 (MXU-fast); accumulation stays f32.
    @pl.when(pl.program_id(2) == 0)
    def _():
        acc_ref[...] = jnp.zeros_like(acc_ref)

    acc_ref[...] += jnp.dot(x_ref[...], w_ref[...], preferred_element_type=jnp.float32)

    @pl.when(pl.program_id(2) == pl.num_programs(2) - 1)
    def _():
        o_ref[...] = (acc_ref[...] + b_ref[...]).astype(o_ref.dtype)


def linear(x, w_t, b, *, out_dtype=jnp.float32, tm=None, tv=512, tk=512):
    """x: (M, K) bf16, w_t: (K, V) bf16 (pre-transposed), b: (V,) f32. Returns (M, V) out_dtype."""
    M, K = x.shape
    V = w_t.shape[1]
    cap = _tpu_vmem_capacity_bytes()
    if tm is None:
        # 128-MiB parts (v5e/v6e) afford bigger M tiles -> W_t re-streamed from HBM fewer times.
        tm = 1024 if cap >= 96 * 1024 * 1024 else 512
    tm = _tile(M, tm, 8)
    tv = _tile(V, tv, 128)
    tk = _tile(K, tk, 128)
    return pl.pallas_call(
        linear_kernel,
        out_shape=jax.ShapeDtypeStruct((M, V), out_dtype),
        grid_spec=pltpu.PrefetchScalarGridSpec(
            num_scalar_prefetch=0,
            grid=(M // tm, V // tv, K // tk),
            in_specs=[
                pl.BlockSpec((tm, tk), lambda i, j, k: (i, k)),
                pl.BlockSpec((tk, tv), lambda i, j, k: (k, j)),
                pl.BlockSpec((1, tv), lambda i, j, k: (0, j)),
            ],
            out_specs=pl.BlockSpec((tm, tv), lambda i, j, k: (i, j)),
            scratch_shapes=[pltpu.VMEM((tm, tv), jnp.float32)],
        ),
        compiler_params=pltpu.CompilerParams(
            dimension_semantics=("parallel", "parallel", "arbitrary"),
            vmem_limit_bytes=_vmem_limit_bytes(cap)),
    )(x, w_t, b.reshape(1, -1))


# ------------------------------------------------------------------ GRU recurrence kernel
def _pick_time_chunk(T, max_chunk=8):
    """Largest legal time chunk: divides T and is a multiple of 8, or equals T."""
    if T <= max_chunk:
        return T
    if T % 8 == 0:
        for tc in range(max_chunk - (max_chunk % 8), 7, -8):
            if T % tc == 0:
                return tc
    # TODO(synk): fallback processes the whole sequence in one chunk; pad T to a multiple of 8
    # upstream if VMEM becomes a concern for very long, oddly-sized sequences.
    return T


def _pick_batch_tile(B, max_tb=8):
    tb = min(B, max_tb)
    while B % tb:
        tb -= 1
    return tb


def gru_forward(gi, w_hh_t, b_hh_n, *, out_dtype=jnp.bfloat16):
    """gi: (B, T, 3H) bf16 hoisted input projection (b_ih + b_hh_{r,z} folded in).
    w_hh_t: (H, 3H) bf16 pre-transposed recurrent weights. b_hh_n: (H,) f32 n-gate bias.
    Returns output (B, T, H) batch-first (out_dtype); h_n == output[:, -1, :]."""
    B, T, H3 = gi.shape
    H = H3 // 3
    Tc = _pick_time_chunk(T)
    n_chunks = T // Tc
    tb = _pick_batch_tile(B)
    nb = B // tb
    cap = _tpu_vmem_capacity_bytes()

    def kernel(gi_ref, whh_ref, bhn_ref, out_ref, h_scr):
        # Time (axis 1) is the serial axis; re-zero the hidden state whenever it restarts
        # (i.e. for every batch tile), so nothing leaks across batch tiles / megacore shards.
        @pl.when(pl.program_id(1) == 0)
        def _():
            h_scr[...] = jnp.zeros_like(h_scr)

        whh = whh_ref[...]                                    # (H, 3H) bf16, resident
        bhn = jnp.broadcast_to(bhn_ref[...], (tb, H))         # hoisted: one broadcast per chunk
        h = h_scr[...]                                        # (tb, H) f32 carry

        hs = []
        for t in range(Tc):                                   # short static unroll (Tc <= 8)
            g = gi_ref[:, t, :].astype(jnp.float32)           # per-step (tb, 3H) load
            gh = jnp.dot(h.astype(jnp.bfloat16), whh,         # bf16 MXU op on the serial path
                         preferred_element_type=jnp.float32)  # (tb, 3H) f32
            r = jax.nn.sigmoid(g[:, :H] + gh[:, :H])
            z = jax.nn.sigmoid(g[:, H:2 * H] + gh[:, H:2 * H])
            n = jnp.tanh(g[:, 2 * H:] + r * (gh[:, 2 * H:] + bhn))
            h = (1.0 - z) * n + z * h
            hs.append(h)

        # One dense (tb, Tc, H) store per chunk (no per-step masked single-sublane stores).
        out_ref[...] = jnp.stack(hs, axis=1).astype(out_ref.dtype)
        h_scr[...] = h                                        # carry hidden state to next chunk

    # TODO(synk): when H is large and not a multiple of 128, pad H (zero-padding the extra W_hh
    # rows/cols and head columns) so the r/z/n gate slices land on lane-tile boundaries.
    return pl.pallas_call(
        kernel,
        out_shape=jax.ShapeDtypeStruct((B, T, H), out_dtype),
        grid_spec=pltpu.PrefetchScalarGridSpec(
            num_scalar_prefetch=0,
            grid=(nb, n_chunks),
            in_specs=[
                pl.BlockSpec((tb, Tc, 3 * H), lambda b, c: (b, c, 0)),  # GI chunk (batch-first)
                pl.BlockSpec((H, 3 * H), lambda b, c: (0, 0)),          # W_hh^T (resident)
                pl.BlockSpec((1, H), lambda b, c: (0, 0)),              # b_hh n-slice (resident)
            ],
            out_specs=pl.BlockSpec((tb, Tc, H), lambda b, c: (b, c, 0)),
            scratch_shapes=[pltpu.VMEM((tb, H), jnp.float32)],
        ),
        compiler_params=pltpu.CompilerParams(
            # Batch tiles are independent -> megacore-parallel (v7x); the recurrence (time)
            # is serial and stays the innermost, "arbitrary" axis.
            dimension_semantics=("parallel", "arbitrary"),
            vmem_limit_bytes=_vmem_limit_bytes(cap)),
    )(gi, w_hh_t, b_hh_n.reshape(1, -1))


# ------------------------------------------------------------------ full forward
@jax.jit
def rnnlm_forward(x_ids, params):
    """Equivalent of RNNLM.forward(x) with h_0=None. Returns (W(output), W(h_n))."""
    w_ih, w_hh = params["w_ih"], params["w_hh"]
    b_ih, b_hh = params["b_ih"], params["b_hh"]
    W, b = params["W"], params["b"]
    H = w_hh.shape[1]
    B, T = x_ids.shape
    I = params["emb"].shape[1]
    V = W.shape[0]

    # Pre-transpose + cast weights once in the wrapper: bf16 MXU operands, f32 accumulation.
    w_ih_t = w_ih.T.astype(jnp.bfloat16)                  # (I, 3H)
    w_hh_t = w_hh.T.astype(jnp.bfloat16)                  # (H, 3H)
    W_t = W.T.astype(jnp.bfloat16)                        # (H, V)

    # Fold biases: b_ih (all gates) plus b_hh for the r,z gates go into the hoisted projection;
    # only the n-gate recurrent bias must stay inside the recurrence (it sits under r * (...)).
    bias_gi = b_ih.at[: 2 * H].add(b_hh[: 2 * H])         # (3H,) f32, added post-accumulation
    b_hh_n = b_hh[2 * H:]                                 # (H,) f32

    # Embedding lookup: gather, plain JAX glue.
    # TODO(synk): embedding gather stays outside the kernel (no clean rectangular BlockSpec).
    emb = jnp.take(params["emb"], x_ids, axis=0).astype(jnp.bfloat16)   # (B, T, I) bf16

    # Hoisted input projection for ALL timesteps: one large bf16 MXU matmul; GI stored bf16.
    gi = linear(emb.reshape(B * T, I), w_ih_t, bias_gi,
                out_dtype=jnp.bfloat16).reshape(B, T, 3 * H)

    # Serial GRU recurrence (only h @ W_hh^T per step), batch-first, bf16 output.
    output = gru_forward(gi, w_hh_t, b_hh_n)              # (B, T, H) bf16

    # Tiled vocabulary head over the whole sequence (bf16 operands, f32 logits).
    logits_seq = linear(output.reshape(B * T, H), W_t, b,
                        out_dtype=jnp.float32).reshape(B, T, V)

    # Single-layer GRU: h_n == output[:, -1, :]  =>  W(h_n) == logits_seq[:, -1, :].
    logits_hn = logits_seq[:, -1, :]                      # (B, V)
    return logits_seq, logits_hn


# ------------------------------------------------------------------ pure-JAX f32 reference
def rnnlm_reference(x_ids, params):
    emb = jnp.take(params["emb"], x_ids, axis=0)          # (B, T, I)
    H = params["w_hh"].shape[1]
    B = emb.shape[0]

    def step(h, x_t):
        gi = x_t @ params["w_ih"].T + params["b_ih"]
        gh = h @ params["w_hh"].T + params["b_hh"]
        i_r, i_z, i_n = gi[:, :H], gi[:, H:2 * H], gi[:, 2 * H:]
        h_r, h_z, h_n = gh[:, :H], gh[:, H:2 * H], gh[:, 2 * H:]
        r = jax.nn.sigmoid(i_r + h_r)
        z = jax.nn.sigmoid(i_z + h_z)
        n = jnp.tanh(i_n + r * h_n)
        h_new = (1.0 - z) * n + z * h
        return h_new, h_new

    h0 = jnp.zeros((B, H), jnp.float32)
    h_n, out_t = jax.lax.scan(step, h0, jnp.transpose(emb, (1, 0, 2)))
    output = jnp.transpose(out_t, (1, 0, 2))              # (B, T, H)
    return output @ params["W"].T + params["b"], h_n @ params["W"].T + params["b"]


# ------------------------------------------------------------------ main
if __name__ == "__main__":
    vocab_size, inp, hid = 16, 32, 32
    B, T = 2, 8

    key = jax.random.PRNGKey(0)
    ks = jax.random.split(key, 8)
    bound = 1.0 / jnp.sqrt(hid)
    xav = jnp.sqrt(6.0 / (hid + vocab_size))
    params = {
        "emb":  jax.random.normal(ks[0], (vocab_size, inp), jnp.float32),              # nn.Embedding
        "w_ih": jax.random.uniform(ks[1], (3 * hid, inp), jnp.float32, -bound, bound),
        "w_hh": jax.random.uniform(ks[2], (3 * hid, hid), jnp.float32, -bound, bound),
        "b_ih": jax.random.uniform(ks[3], (3 * hid,), jnp.float32, -bound, bound),
        "b_hh": jax.random.uniform(ks[4], (3 * hid,), jnp.float32, -bound, bound),
        "W":    jax.random.uniform(ks[5], (vocab_size, hid), jnp.float32, -xav, xav),   # xavier_uniform
        "b":    jax.random.uniform(ks[6], (vocab_size,), jnp.float32, -bound, bound),
    }

    x_ids = jax.random.randint(ks[7], (B, T), 0, vocab_size, dtype=jnp.int32)

    logits_seq, logits_hn = rnnlm_forward(x_ids, params)
    jax.block_until_ready((logits_seq, logits_hn))

    ref_seq, ref_hn = rnnlm_reference(x_ids, params)
    assert logits_seq.shape == (B, T, vocab_size)
    assert logits_hn.shape == (B, vocab_size)
    # bf16 MXU operands + bf16 GI/hidden storage: compare against the f32 reference with a
    # correspondingly loosened tolerance (per the review's correctness note).
    assert jnp.allclose(logits_seq, ref_seq, atol=5e-2, rtol=5e-2)
    assert jnp.allclose(logits_hn, ref_hn, atol=5e-2, rtol=5e-2)

    print("KERNEL_OK")
</pallas_src>

<mosaic_0001>
module attributes {stable_mosaic.version = 11 : i64} {
  func.func @linear_kernel(%arg0: i32, %arg1: i32, %arg2: i32, %arg3: memref<16x32xbf16, #tpu.memory_space<vmem>>, %arg4: memref<32x96xbf16, #tpu.memory_space<vmem>>, %arg5: memref<1x96xf32, #tpu.memory_space<vmem>>, %arg6: memref<16x96xbf16, #tpu.memory_space<vmem>>, %arg7: memref<16x96xf32, #tpu.memory_space<vmem>>) attributes {dimension_semantics = [#tpu.dimension_semantics<parallel>, #tpu.dimension_semantics<parallel>, #tpu.dimension_semantics<arbitrary>], iteration_bounds = array<i64: 1, 1, 1>, scalar_prefetch = 0 : i64, scratch_operands = 1 : i64, tpu.core_type = #tpu.core_type<tc>, window_params = [{transform_indices = @transform_0, window_bounds = array<i64: 16, 32>}, {transform_indices = @transform_1, window_bounds = array<i64: 32, 96>}, {transform_indices = @transform_2, window_bounds = array<i64: 1, 96>}, {transform_indices = @transform_3, window_bounds = array<i64: 16, 96>}]} {
    %c0_i32 = arith.constant 0 : i32
    %0 = arith.cmpi eq, %arg2, %c0_i32 : i32
    %1 = arith.extui %0 : i1 to i32
    %c0_i32_0 = arith.constant 0 : i32
    %2 = arith.cmpi ne, %1, %c0_i32_0 : i32
    scf.if %2 {
      %cst_10 = arith.constant 0.000000e+00 : f32
      %12 = vector.broadcast %cst_10 : f32 to vector<16x96xf32>
      %c0_11 = arith.constant 0 : index
      %c0_12 = arith.constant 0 : index
      %13 = vector.load %arg7[%c0_11, %c0_12] : memref<16x96xf32, #tpu.memory_space<vmem>>, vector<16x96xf32>
      tpu.vector_store %arg7[%c0_11, %c0_12], %12 {strides = array<i32>} : memref<16x96xf32, #tpu.memory_space<vmem>>, vector<16x96xf32>,
    } else {
    }
    %c0 = arith.constant 0 : index
    %c0_1 = arith.constant 0 : index
    %3 = vector.load %arg7[%c0, %c0_1] : memref<16x96xf32, #tpu.memory_space<vmem>>, vector<16x96xf32>
    %c0_2 = arith.constant 0 : index
    %c0_3 = arith.constant 0 : index
    %4 = vector.load %arg3[%c0_2, %c0_3] : memref<16x32xbf16, #tpu.memory_space<vmem>>, vector<16x32xbf16>
    %c0_4 = arith.constant 0 : index
    %c0_5 = arith.constant 0 : index
    %5 = vector.load %arg4[%c0_4, %c0_5] : memref<32x96xbf16, #tpu.memory_space<vmem>>, vector<32x96xbf16>
    %cst = arith.constant dense<0.000000e+00> : vector<16x96xf32>
    %6 = tpu.matmul %4, %5, %cst {dimension_numbers = #tpu.dot_dimension_numbers<[1], [0], [0], [1], [0, 0, 1, 1], [], []>} : vector<16x32xbf16>, vector<32x96xbf16>, vector<16x96xf32> -> vector<16x96xf32>
    %7 = arith.addf %3, %6 : vector<16x96xf32>
    %c0_6 = arith.constant 0 : index
    %c0_7 = arith.constant 0 : index
    %8 = vector.load %arg7[%c0_6, %c0_7] : memref<16x96xf32, #tpu.memory_space<vmem>>, vector<16x96xf32>
    tpu.vector_store %arg7[%c0_6, %c0_7], %7 {strides = array<i32>} : memref<16x96xf32, #tpu.memory_space<vmem>>, vector<16x96xf32>,
    %c0_i32_8 = arith.constant 0 : i32
    %9 = arith.cmpi eq, %arg2, %c0_i32_8 : i32
    %10 = arith.extui %9 : i1 to i32
    %c0_i32_9 = arith.constant 0 : i32
    %11 = arith.cmpi ne, %10, %c0_i32_9 : i32
    scf.if %11 {
      %c0_10 = arith.constant 0 : index
      %c0_11 = arith.constant 0 : index
      %12 = vector.load %arg7[%c0_10, %c0_11] : memref<16x96xf32, #tpu.memory_space<vmem>>, vector<16x96xf32>
      %c0_12 = arith.constant 0 : index
      %c0_13 = arith.constant 0 : index
      %13 = vector.load %arg5[%c0_12, %c0_13] : memref<1x96xf32, #tpu.memory_space<vmem>>, vector<1x96xf32>
      %14 = vector.broadcast %13 : vector<1x96xf32> to vector<16x96xf32>
      %15 = arith.addf %12, %14 : vector<16x96xf32>
      %16 = arith.truncf %15 : vector<16x96xf32> to vector<16x96xbf16>
      %c0_14 = arith.constant 0 : index
      %c0_15 = arith.constant 0 : index
      %17 = vector.load %arg6[%c0_14, %c0_15] : memref<16x96xbf16, #tpu.memory_space<vmem>>, vector<16x96xbf16>
      tpu.vector_store %arg6[%c0_14, %c0_15], %16 {strides = array<i32>} : memref<16x96xbf16, #tpu.memory_space<vmem>>, vector<16x96xbf16>,
    } else {
    }
    return
  }
  func.func @transform_0(%arg0: i32, %arg1: i32, %arg2: i32) -> (i32, i32) {
    %c0_i32 = arith.constant 0 : i32
    return %arg0, %arg2 : i32, i32
  }
  func.func @transform_1(%arg0: i32, %arg1: i32, %arg2: i32) -> (i32, i32) {
    %c0_i32 = arith.constant 0 : i32
    return %arg2, %arg1 : i32, i32
  }
  func.func @transform_2(%arg0: i32, %arg1: i32, %arg2: i32) -> (i32, i32) {
    %c0_i32 = arith.constant 0 : i32
    %c0_i32_0 = arith.constant 0 : i32
    return %c0_i32, %arg1 : i32, i32
  }
  func.func @transform_3(%arg0: i32, %arg1: i32, %arg2: i32) -> (i32, i32) {
    %c0_i32 = arith.constant 0 : i32
    return %arg0, %arg1 : i32, i32
  }
}

module attributes {stable_mosaic.version = 11 : i64} {
  func.func @kernel(%arg0: i32, %arg1: i32, %arg2: memref<2x8x96xbf16, #tpu.memory_space<vmem>>, %arg3: memref<32x96xbf16, #tpu.memory_space<vmem>>, %arg4: memref<1x32xf32, #tpu.memory_space<vmem>>, %arg5: memref<2x8x32xbf16, #tpu.memory_space<vmem>>, %arg6: memref<2x32xf32, #tpu.memory_space<vmem>>) attributes {dimension_semantics = [#tpu.dimension_semantics<parallel>, #tpu.dimension_semantics<arbitrary>], iteration_bounds = array<i64: 1, 1>, scalar_prefetch = 0 : i64, scratch_operands = 1 : i64, tpu.core_type = #tpu.core_type<tc>, window_params = [{transform_indices = @transform_0, window_bounds = array<i64: 2, 8, 96>}, {pipeline_mode = #tpu.pipeline_mode<synchronous>, transform_indices = @transform_1, window_bounds = array<i64: 32, 96>}, {pipeline_mode = #tpu.pipeline_mode<synchronous>, transform_indices = @transform_2, window_bounds = array<i64: 1, 32>}, {transform_indices = @transform_3, window_bounds = array<i64: 2, 8, 32>}]} {
    %c0_i32 = arith.constant 0 : i32
    %0 = arith.cmpi eq, %arg1, %c0_i32 : i32
    %1 = arith.extui %0 : i1 to i32
    %c0_i32_0 = arith.constant 0 : i32
    %2 = arith.cmpi ne, %1, %c0_i32_0 : i32
    scf.if %2 {
      %cst_59 = arith.constant 0.000000e+00 : f32
      %276 = vector.broadcast %cst_59 : f32 to vector<2x32xf32>
      %c0_60 = arith.constant 0 : index
      %c0_61 = arith.constant 0 : index
      %277 = vector.load %arg6[%c0_60, %c0_61] : memref<2x32xf32, #tpu.memory_space<vmem>>, vector<2x32xf32>
      tpu.vector_store %arg6[%c0_60, %c0_61], %276 {strides = array<i32>} : memref<2x32xf32, #tpu.memory_space<vmem>>, vector<2x32xf32>,
    } else {
    }
    %c0 = arith.constant 0 : index
    %c0_1 = arith.constant 0 : index
    %3 = vector.load %arg3[%c0, %c0_1] : memref<32x96xbf16, #tpu.memory_space<vmem>>, vector<32x96xbf16>
    %c0_2 = arith.constant 0 : index
    %c0_3 = arith.constant 0 : index
    %4 = vector.load %arg4[%c0_2, %c0_3] : memref<1x32xf32, #tpu.memory_space<vmem>>, vector<1x32xf32>
    %5 = vector.shape_cast %4 : vector<1x32xf32> to vector<1x32xf32>
    %6 = vector.broadcast %5 : vector<1x32xf32> to vector<2x32xf32>
    %c0_4 = arith.constant 0 : index
    %c0_5 = arith.constant 0 : index
    %7 = vector.load %arg6[%c0_4, %c0_5] : memref<2x32xf32, #tpu.memory_space<vmem>>, vector<2x32xf32>
    %c0_6 = arith.constant 0 : index
    %c0_7 = arith.constant 0 : index
    %c0_8 = arith.constant 0 : index
    %8 = vector.load %arg2[%c0_6, %c0_7, %c0_8] : memref<2x8x96xbf16, #tpu.memory_space<vmem>>, vector<2x1x96xbf16>
    %9 = vector.shape_cast %8 : vector<2x1x96xbf16> to vector<2x96xbf16>
    %10 = arith.extf %9 : vector<2x96xbf16> to vector<2x96xf32>
    %11 = arith.truncf %7 : vector<2x32xf32> to vector<2x32xbf16>
    %cst = arith.constant dense<0.000000e+00> : vector<2x96xf32>
    %12 = tpu.matmul %11, %3, %cst {dimension_numbers = #tpu.dot_dimension_numbers<[1], [0], [0], [1], [0, 0, 1, 1], [], []>} : vector<2x32xbf16>, vector<32x96xbf16>, vector<2x96xf32> -> vector<2x96xf32>
    %13 = vector.extract_strided_slice %10 {offsets = [0, 0], sizes = [2, 32], strides = [1, 1]} : vector<2x96xf32> to vector<2x32xf32>
    %14 = vector.extract_strided_slice %12 {offsets = [0, 0], sizes = [2, 32], strides = [1, 1]} : vector<2x96xf32> to vector<2x32xf32>
    %15 = arith.addf %13, %14 : vector<2x32xf32>
    %16 = arith.negf %15 : vector<2x32xf32>
    %17 = math.exp %16 : vector<2x32xf32>
    %cst_9 = arith.constant 1.000000e+00 : f32
    %18 = vector.broadcast %cst_9 : f32 to vector<2x32xf32>
    %19 = arith.addf %18, %17 : vector<2x32xf32>
    %20 = arith.divf %18, %19 : vector<2x32xf32>
    %21 = vector.extract_strided_slice %10 {offsets = [0, 32], sizes = [2, 32], strides = [1, 1]} : vector<2x96xf32> to vector<2x32xf32>
    %22 = vector.extract_strided_slice %12 {offsets = [0, 32], sizes = [2, 32], strides = [1, 1]} : vector<2x96xf32> to vector<2x32xf32>
    %23 = arith.addf %21, %22 : vector<2x32xf32>
    %24 = arith.negf %23 : vector<2x32xf32>
    %25 = math.exp %24 : vector<2x32xf32>
    %cst_10 = arith.constant 1.000000e+00 : f32
    %26 = vector.broadcast %cst_10 : f32 to vector<2x32xf32>
    %27 = arith.addf %26, %25 : vector<2x32xf32>
    %28 = arith.divf %26, %27 : vector<2x32xf32>
    %29 = vector.extract_strided_slice %10 {offsets = [0, 64], sizes = [2, 32], strides = [1, 1]} : vector<2x96xf32> to vector<2x32xf32>
    %30 = vector.extract_strided_slice %12 {offsets = [0, 64], sizes = [2, 32], strides = [1, 1]} : vector<2x96xf32> to vector<2x32xf32>
    %31 = arith.addf %30, %6 : vector<2x32xf32>
    %32 = arith.mulf %20, %31 : vector<2x32xf32>
    %33 = arith.addf %29, %32 : vector<2x32xf32>
    %34 = math.tanh %33 : vector<2x32xf32>
    %cst_11 = arith.constant 1.000000e+00 : f32
    %35 = vector.broadcast %cst_11 : f32 to vector<2x32xf32>
    %36 = arith.subf %35, %28 : vector<2x32xf32>
    %37 = arith.mulf %36, %34 : vector<2x32xf32>
    %38 = arith.mulf %28, %7 : vector<2x32xf32>
    %39 = arith.addf %37, %38 : vector<2x32xf32>
    %c0_12 = arith.constant 0 : index
    %c1 = arith.constant 1 : index
    %c0_13 = arith.constant 0 : index
    %40 = vector.load %arg2[%c0_12, %c1, %c0_13] : memref<2x8x96xbf16, #tpu.memory_space<vmem>>, vector<2x1x96xbf16>
    %41 = vector.shape_cast %40 : vector<2x1x96xbf16> to vector<2x96xbf16>
    %42 = arith.extf %41 : vector<2x96xbf16> to vector<2x96xf32>
    %43 = arith.truncf %39 : vector<2x32xf32> to vector<2x32xbf16>
    %cst_14 = arith.constant dense<0.000000e+00> : vector<2x96xf32>
    %44 = tpu.matmul %43, %3, %cst_14 {dimension_numbers = #tpu.dot_dimension_numbers<[1], [0], [0], [1], [0, 0, 1, 1], [], []>} : vector<2x32xbf16>, vector<32x96xbf16>, vector<2x96xf32> -> vector<2x96xf32>
    %45 = vector.extract_strided_slice %42 {offsets = [0, 0], sizes = [2, 32], strides = [1, 1]} : vector<2x96xf32> to vector<2x32xf32>
    %46 = vector.extract_strided_slice %44 {offsets = [0, 0], sizes = [2, 32], strides = [1, 1]} : vector<2x96xf32> to vector<2x32xf32>
    %47 = arith.addf %45, %46 : vector<2x32xf32>
    %48 = arith.negf %47 : vector<2x32xf32>
    %49 = math.exp %48 : vector<2x32xf32>
    %cst_15 = arith.constant 1.000000e+00 : f32
    %50 = vector.broadcast %cst_15 : f32 to vector<2x32xf32>
    %51 = arith.addf %50, %49 : vector<2x32xf32>
    %52 = arith.divf %50, %51 : vector<2x32xf32>
    %53 = vector.extract_strided_slice %42 {offsets = [0, 32], sizes = [2, 32], strides = [1, 1]} : vector<2x96xf32> to vector<2x32xf32>
    %54 = vector.extract_strided_slice %44 {offsets = [0, 32], sizes = [2, 32], strides = [1, 1]} : vector<2x96xf32> to vector<2x32xf32>
    %55 = arith.addf %53, %54 : vector<2x32xf32>
    %56 = arith.negf %55 : vector<2x32xf32>
    %57 = math.exp %56 : vector<2x32xf32>
    %cst_16 = arith.constant 1.000000e+00 : f32
    %58 = vector.broadcast %cst_16 : f32 to vector<2x32xf32>
    %59 = arith.addf %58, %57 : vector<2x32xf32>
    %60 = arith.divf %58, %59 : vector<2x32xf32>
    %61 = vector.extract_strided_slice %42 {offsets = [0, 64], sizes = [2, 32], strides = [1, 1]} : vector<2x96xf32> to vector<2x32xf32>
    %62 = vector.extract_strided_slice %44 {offsets = [0, 64], sizes = [2, 32], strides = [1, 1]} : vector<2x96xf32> to vector<2x32xf32>
    %63 = arith.addf %62, %6 : vector<2x32xf32>
    %64 = arith.mulf %52, %63 : vector<2x32xf32>
    %65 = arith.addf %61, %64 : vector<2x32xf32>
    %66 = math.tanh %65 : vector<2x32xf32>
    %cst_17 = arith.constant 1.000000e+00 : f32
    %67 = vector.broadcast %cst_17 : f32 to vector<2x32xf32>
    %68 = arith.subf %67, %60 : vector<2x32xf32>
    %69 = arith.mulf %68, %66 : vector<2x32xf32>
    %70 = arith.mulf %60, %39 : vector<2x32xf32>
    %71 = arith.addf %69, %70 : vector<2x32xf32>
    %c0_18 = arith.constant 0 : index
    %c2 = arith.constant 2 : index
    %c0_19 = arith.constant 0 : index
    %72 = vector.load %arg2[%c0_18, %c2, %c0_19] : memref<2x8x96xbf16, #tpu.memory_space<vmem>>, vector<2x1x96xbf16>
    %73 = vector.shape_cast %72 : vector<2x1x96xbf16> to vector<2x96xbf16>
    %74 = arith.extf %73 : vector<2x96xbf16> to vector<2x96xf32>
    %75 = arith.truncf %71 : vector<2x32xf32> to vector<2x32xbf16>
    %cst_20 = arith.constant dense<0.000000e+00> : vector<2x96xf32>
    %76 = tpu.matmul %75, %3, %cst_20 {dimension_numbers = #tpu.dot_dimension_numbers<[1], [0], [0], [1], [0, 0, 1, 1], [], []>} : vector<2x32xbf16>, vector<32x96xbf16>, vector<2x96xf32> -> vector<2x96xf32>
    %77 = vector.extract_strided_slice %74 {offsets = [0, 0], sizes = [2, 32], strides = [1, 1]} : vector<2x96xf32> to vector<2x32xf32>
    %78 = vector.extract_strided_slice %76 {offsets = [0, 0], sizes = [2, 32], strides = [1, 1]} : vector<2x96xf32> to vector<2x32xf32>
    %79 = arith.addf %77, %78 : vector<2x32xf32>
    %80 = arith.negf %79 : vector<2x32xf32>
    %81 = math.exp %80 : vector<2x32xf32>
    %cst_21 = arith.constant 1.000000e+00 : f32
    %82 = vector.broadcast %cst_21 : f32 to vector<2x32xf32>
    %83 = arith.addf %82, %81 : vector<2x32xf32>
    %84 = arith.divf %82, %83 : vector<2x32xf32>
    %85 = vector.extract_strided_slice %74 {offsets = [0, 32], sizes = [2, 32], strides = [1, 1]} : vector<2x96xf32> to vector<2x32xf32>
    %86 = vector.extract_strided_slice %76 {offsets = [0, 32], sizes = [2, 32], strides = [1, 1]} : vector<2x96xf32> to vector<2x32xf32>
    %87 = arith.addf %85, %86 : vector<2x32xf32>
    %88 = arith.negf %87 : vector<2x32xf32>
    %89 = math.exp %88 : vector<2x32xf32>
    %cst_22 = arith.constant 1.000000e+00 : f32
    %90 = vector.broadcast %cst_22 : f32 to vector<2x32xf32>
    %91 = arith.addf %90, %89 : vector<2x32xf32>
    %92 = arith.divf %90, %91 : vector<2x32xf32>
    %93 = vector.extract_strided_slice %74 {offsets = [0, 64], sizes = [2, 32], strides = [1, 1]} : vector<2x96xf32> to vector<2x32xf32>
    %94 = vector.extract_strided_slice %76 {offsets = [0, 64], sizes = [2, 32], strides = [1, 1]} : vector<2x96xf32> to vector<2x32xf32>
    %95 = arith.addf %94, %6 : vector<2x32xf32>
    %96 = arith.mulf %84, %95 : vector<2x32xf32>
    %97 = arith.addf %93, %96 : vector<2x32xf32>
    %98 = math.tanh %97 : vector<2x32xf32>
    %cst_23 = arith.constant 1.000000e+00 : f32
    %99 = vector.broadcast %cst_23 : f32 to vector<2x32xf32>
    %100 = arith.subf %99, %92 : vector<2x32xf32>
    %101 = arith.mulf %100, %98 : vector<2x32xf32>
    %102 = arith.mulf %92, %71 : vector<2x32xf32>
    %103 = arith.addf %101, %102 : vector<2x32xf32>
    %c0_24 = arith.constant 0 : index
    %c3 = arith.constant 3 : index
    %c0_25 = arith.constant 0 : index
    %104 = vector.load %arg2[%c0_24, %c3, %c0_25] : memref<2x8x96xbf16, #tpu.memory_space<vmem>>, vector<2x1x96xbf16>
    %105 = vector.shape_cast %104 : vector<2x1x96xbf16> to vector<2x96xbf16>
    %106 = arith.extf %105 : vector<2x96xbf16> to vector<2x96xf32>
    %107 = arith.truncf %103 : vector<2x32xf32> to vector<2x32xbf16>
    %cst_26 = arith.constant dense<0.000000e+00> : vector<2x96xf32>
    %108 = tpu.matmul %107, %3, %cst_26 {dimension_numbers = #tpu.dot_dimension_numbers<[1], [0], [0], [1], [0, 0, 1, 1], [], []>} : vector<2x32xbf16>, vector<32x96xbf16>, vector<2x96xf32> -> vector<2x96xf32>
    %109 = vector.extract_strided_slice %106 {offsets = [0, 0], sizes = [2, 32], strides = [1, 1]} : vector<2x96xf32> to vector<2x32xf32>
    %110 = vector.extract_strided_slice %108 {offsets = [0, 0], sizes = [2, 32], strides = [1, 1]} : vector<2x96xf32> to vector<2x32xf32>
    %111 = arith.addf %109, %110 : vector<2x32xf32>
    %112 = arith.negf %111 : vector<2x32xf32>
    %113 = math.exp %112 : vector<2x32xf32>
    %cst_27 = arith.constant 1.000000e+00 : f32
    %114 = vector.broadcast %cst_27 : f32 to vector<2x32xf32>
    %115 = arith.addf %114, %113 : vector<2x32xf32>
    %116 = arith.divf %114, %115 : vector<2x32xf32>
    %117 = vector.extract_strided_slice %106 {offsets = [0, 32], sizes = [2, 32], strides = [1, 1]} : vector<2x96xf32> to vector<2x32xf32>
    %118 = vector.extract_strided_slice %108 {offsets = [0, 32], sizes = [2, 32], strides = [1, 1]} : vector<2x96xf32> to vector<2x32xf32>
    %119 = arith.addf %117, %118 : vector<2x32xf32>
    %120 = arith.negf %119 : vector<2x32xf32>
    %121 = math.exp %120 : vector<2x32xf32>
    %cst_28 = arith.constant 1.000000e+00 : f32
    %122 = vector.broadcast %cst_28 : f32 to vector<2x32xf32>
    %123 = arith.addf %122, %121 : vector<2x32xf32>
    %124 = arith.divf %122, %123 : vector<2x32xf32>
    %125 = vector.extract_strided_slice %106 {offsets = [0, 64], sizes = [2, 32], strides = [1, 1]} : vector<2x96xf32> to vector<2x32xf32>
    %126 = vector.extract_strided_slice %108 {offsets = [0, 64], sizes = [2, 32], strides = [1, 1]} : vector<2x96xf32> to vector<2x32xf32>
    %127 = arith.addf %126, %6 : vector<2x32xf32>
    %128 = arith.mulf %116, %127 : vector<2x32xf32>
    %129 = arith.addf %125, %128 : vector<2x32xf32>
    %130 = math.tanh %129 : vector<2x32xf32>
    %cst_29 = arith.constant 1.000000e+00 : f32
    %131 = vector.broadcast %cst_29 : f32 to vector<2x32xf32>
    %132 = arith.subf %131, %124 : vector<2x32xf32>
    %133 = arith.mulf %132, %130 : vector<2x32xf32>
    %134 = arith.mulf %124, %103 : vector<2x32xf32>
    %135 = arith.addf %133, %134 : vector<2x32xf32>
    %c0_30 = arith.constant 0 : index
    %c4 = arith.constant 4 : index
    %c0_31 = arith.constant 0 : index
    %136 = vector.load %arg2[%c0_30, %c4, %c0_31] : memref<2x8x96xbf16, #tpu.memory_space<vmem>>, vector<2x1x96xbf16>
    %137 = vector.shape_cast %136 : vector<2x1x96xbf16> to vector<2x96xbf16>
    %138 = arith.extf %137 : vector<2x96xbf16> to vector<2x96xf32>
    %139 = arith.truncf %135 : vector<2x32xf32> to vector<2x32xbf16>
    %cst_32 = arith.constant dense<0.000000e+00> : vector<2x96xf32>
    %140 = tpu.matmul %139, %3, %cst_32 {dimension_numbers = #tpu.dot_dimension_numbers<[1], [0], [0], [1], [0, 0, 1, 1], [], []>} : vector<2x32xbf16>, vector<32x96xbf16>, vector<2x96xf32> -> vector<2x96xf32>
    %141 = vector.extract_strided_slice %138 {offsets = [0, 0], sizes = [2, 32], strides = [1, 1]} : vector<2x96xf32> to vector<2x32xf32>
    %142 = vector.extract_strided_slice %140 {offsets = [0, 0], sizes = [2, 32], strides = [1, 1]} : vector<2x96xf32> to vector<2x32xf32>
    %143 = arith.addf %141, %142 : vector<2x32xf32>
    %144 = arith.negf %143 : vector<2x32xf32>
    %145 = math.exp %144 : vector<2x32xf32>
    %cst_33 = arith.constant 1.000000e+00 : f32
    %146 = vector.broadcast %cst_33 : f32 to vector<2x32xf32>
    %147 = arith.addf %146, %145 : vector<2x32xf32>
    %148 = arith.divf %146, %147 : vector<2x32xf32>
    %149 = vector.extract_strided_slice %138 {offsets = [0, 32], sizes = [2, 32], strides = [1, 1]} : vector<2x96xf32> to vector<2x32xf32>
    %150 = vector.extract_strided_slice %140 {offsets = [0, 32], sizes = [2, 32], strides = [1, 1]} : vector<2x96xf32> to vector<2x32xf32>
    %151 = arith.addf %149, %150 : vector<2x32xf32>
    %152 = arith.negf %151 : vector<2x32xf32>
    %153 = math.exp %152 : vector<2x32xf32>
    %cst_34 = arith.constant 1.000000e+00 : f32
    %154 = vector.broadcast %cst_34 : f32 to vector<2x32xf32>
    %155 = arith.addf %154, %153 : vector<2x32xf32>
    %156 = arith.divf %154, %155 : vector<2x32xf32>
    %157 = vector.extract_strided_slice %138 {offsets = [0, 64], sizes = [2, 32], strides = [1, 1]} : vector<2x96xf32> to vector<2x32xf32>
    %158 = vector.extract_strided_slice %140 {offsets = [0, 64], sizes = [2, 32], strides = [1, 1]} : vector<2x96xf32> to vector<2x32xf32>
    %159 = arith.addf %158, %6 : vector<2x32xf32>
    %160 = arith.mulf %148, %159 : vector<2x32xf32>
    %161 = arith.addf %157, %160 : vector<2x32xf32>
    %162 = math.tanh %161 : vector<2x32xf32>
    %cst_35 = arith.constant 1.000000e+00 : f32
    %163 = vector.broadcast %cst_35 : f32 to vector<2x32xf32>
    %164 = arith.subf %163, %156 : vector<2x32xf32>
    %165 = arith.mulf %164, %162 : vector<2x32xf32>
    %166 = arith.mulf %156, %135 : vector<2x32xf32>
    %167 = arith.addf %165, %166 : vector<2x32xf32>
    %c0_36 = arith.constant 0 : index
    %c5 = arith.constant 5 : index
    %c0_37 = arith.constant 0 : index
    %168 = vector.load %arg2[%c0_36, %c5, %c0_37] : memref<2x8x96xbf16, #tpu.memory_space<vmem>>, vector<2x1x96xbf16>
    %169 = vector.shape_cast %168 : vector<2x1x96xbf16> to vector<2x96xbf16>
    %170 = arith.extf %169 : vector<2x96xbf16> to vector<2x96xf32>
    %171 = arith.truncf %167 : vector<2x32xf32> to vector<2x32xbf16>
    %cst_38 = arith.constant dense<0.000000e+00> : vector<2x96xf32>
    %172 = tpu.matmul %171, %3, %cst_38 {dimension_numbers = #tpu.dot_dimension_numbers<[1], [0], [0], [1], [0, 0, 1, 1], [], []>} : vector<2x32xbf16>, vector<32x96xbf16>, vector<2x96xf32> -> vector<2x96xf32>
    %173 = vector.extract_strided_slice %170 {offsets = [0, 0], sizes = [2, 32], strides = [1, 1]} : vector<2x96xf32> to vector<2x32xf32>
    %174 = vector.extract_strided_slice %172 {offsets = [0, 0], sizes = [2, 32], strides = [1, 1]} : vector<2x96xf32> to vector<2x32xf32>
    %175 = arith.addf %173, %174 : vector<2x32xf32>
    %176 = arith.negf %175 : vector<2x32xf32>
    %177 = math.exp %176 : vector<2x32xf32>
    %cst_39 = arith.constant 1.000000e+00 : f32
    %178 = vector.broadcast %cst_39 : f32 to vector<2x32xf32>
    %179 = arith.addf %178, %177 : vector<2x32xf32>
    %180 = arith.divf %178, %179 : vector<2x32xf32>
    %181 = vector.extract_strided_slice %170 {offsets = [0, 32], sizes = [2, 32], strides = [1, 1]} : vector<2x96xf32> to vector<2x32xf32>
    %182 = vector.extract_strided_slice %172 {offsets = [0, 32], sizes = [2, 32], strides = [1, 1]} : vector<2x96xf32> to vector<2x32xf32>
    %183 = arith.addf %181, %182 : vector<2x32xf32>
    %184 = arith.negf %183 : vector<2x32xf32>
    %185 = math.exp %184 : vector<2x32xf32>
    %cst_40 = arith.constant 1.000000e+00 : f32
    %186 = vector.broadcast %cst_40 : f32 to vector<2x32xf32>
    %187 = arith.addf %186, %185 : vector<2x32xf32>
    %188 = arith.divf %186, %187 : vector<2x32xf32>
    %189 = vector.extract_strided_slice %170 {offsets = [0, 64], sizes = [2, 32], strides = [1, 1]} : vector<2x96xf32> to vector<2x32xf32>
    %190 = vector.extract_strided_slice %172 {offsets = [0, 64], sizes = [2, 32], strides = [1, 1]} : vector<2x96xf32> to vector<2x32xf32>
    %191 = arith.addf %190, %6 : vector<2x32xf32>
    %192 = arith.mulf %180, %191 : vector<2x32xf32>
    %193 = arith.addf %189, %192 : vector<2x32xf32>
    %194 = math.tanh %193 : vector<2x32xf32>
    %cst_41 = arith.constant 1.000000e+00 : f32
    %195 = vector.broadcast %cst_41 : f32 to vector<2x32xf32>
    %196 = arith.subf %195, %188 : vector<2x32xf32>
    %197 = arith.mulf %196, %194 : vector<2x32xf32>
    %198 = arith.mulf %188, %167 : vector<2x32xf32>
    %199 = arith.addf %197, %198 : vector<2x32xf32>
    %c0_42 = arith.constant 0 : index
    %c6 = arith.constant 6 : index
    %c0_43 = arith.constant 0 : index
    %200 = vector.load %arg2[%c0_42, %c6, %c0_43] : memref<2x8x96xbf16, #tpu.memory_space<vmem>>, vector<2x1x96xbf16>
    %201 = vector.shape_cast %200 : vector<2x1x96xbf16> to vector<2x96xbf16>
    %202 = arith.extf %201 : vector<2x96xbf16> to vector<2x96xf32>
    %203 = arith.truncf %199 : vector<2x32xf32> to vector<2x32xbf16>
    %cst_44 = arith.constant dense<0.000000e+00> : vector<2x96xf32>
    %204 = tpu.matmul %203, %3, %cst_44 {dimension_numbers = #tpu.dot_dimension_numbers<[1], [0], [0], [1], [0, 0, 1, 1], [], []>} : vector<2x32xbf16>, vector<32x96xbf16>, vector<2x96xf32> -> vector<2x96xf32>
    %205 = vector.extract_strided_slice %202 {offsets = [0, 0], sizes = [2, 32], strides = [1, 1]} : vector<2x96xf32> to vector<2x32xf32>
    %206 = vector.extract_strided_slice %204 {offsets = [0, 0], sizes = [2, 32], strides = [1, 1]} : vector<2x96xf32> to vector<2x32xf32>
    %207 = arith.addf %205, %206 : vector<2x32xf32>
    %208 = arith.negf %207 : vector<2x32xf32>
    %209 = math.exp %208 : vector<2x32xf32>
    %cst_45 = arith.constant 1.000000e+00 : f32
    %210 = vector.broadcast %cst_45 : f32 to vector<2x32xf32>
    %211 = arith.addf %210, %209 : vector<2x32xf32>
    %212 = arith.divf %210, %211 : vector<2x32xf32>
    %213 = vector.extract_strided_slice %202 {offsets = [0, 32], sizes = [2, 32], strides = [1, 1]} : vector<2x96xf32> to vector<2x32xf32>
    %214 = vector.extract_strided_slice %204 {offsets = [0, 32], sizes = [2, 32], strides = [1, 1]} : vector<2x96xf32> to vector<2x32xf32>
    %215 = arith.addf %213, %214 : vector<2x32xf32>
    %216 = arith.negf %215 : vector<2x32xf32>
    %217 = math.exp %216 : vector<2x32xf32>
    %cst_46 = arith.constant 1.000000e+00 : f32
    %218 = vector.broadcast %cst_46 : f32 to vector<2x32xf32>
    %219 = arith.addf %218, %217 : vector<2x32xf32>
    %220 = arith.divf %218, %219 : vector<2x32xf32>
    %221 = vector.extract_strided_slice %202 {offsets = [0, 64], sizes = [2, 32], strides = [1, 1]} : vector<2x96xf32> to vector<2x32xf32>
    %222 = vector.extract_strided_slice %204 {offsets = [0, 64], sizes = [2, 32], strides = [1, 1]} : vector<2x96xf32> to vector<2x32xf32>
    %223 = arith.addf %222, %6 : vector<2x32xf32>
    %224 = arith.mulf %212, %223 : vector<2x32xf32>
    %225 = arith.addf %221, %224 : vector<2x32xf32>
    %226 = math.tanh %225 : vector<2x32xf32>
    %cst_47 = arith.constant 1.000000e+00 : f32
    %227 = vector.broadcast %cst_47 : f32 to vector<2x32xf32>
    %228 = arith.subf %227, %220 : vector<2x32xf32>
    %229 = arith.mulf %228, %226 : vector<2x32xf32>
    %230 = arith.mulf %220, %199 : vector<2x32xf32>
    %231 = arith.addf %229, %230 : vector<2x32xf32>
    %c0_48 = arith.constant 0 : index
    %c7 = arith.constant 7 : index
    %c0_49 = arith.constant 0 : index
    %232 = vector.load %arg2[%c0_48, %c7, %c0_49] : memref<2x8x96xbf16, #tpu.memory_space<vmem>>, vector<2x1x96xbf16>
    %233 = vector.shape_cast %232 : vector<2x1x96xbf16> to vector<2x96xbf16>
    %234 = arith.extf %233 : vector<2x96xbf16> to vector<2x96xf32>
    %235 = arith.truncf %231 : vector<2x32xf32> to vector<2x32xbf16>
    %cst_50 = arith.constant dense<0.000000e+00> : vector<2x96xf32>
    %236 = tpu.matmul %235, %3, %cst_50 {dimension_numbers = #tpu.dot_dimension_numbers<[1], [0], [0], [1], [0, 0, 1, 1], [], []>} : vector<2x32xbf16>, vector<32x96xbf16>, vector<2x96xf32> -> vector<2x96xf32>
    %237 = vector.extract_strided_slice %234 {offsets = [0, 0], sizes = [2, 32], strides = [1, 1]} : vector<2x96xf32> to vector<2x32xf32>
    %238 = vector.extract_strided_slice %236 {offsets = [0, 0], sizes = [2, 32], strides = [1, 1]} : vector<2x96xf32> to vector<2x32xf32>
    %239 = arith.addf %237, %238 : vector<2x32xf32>
    %240 = arith.negf %239 : vector<2x32xf32>
    %241 = math.exp %240 : vector<2x32xf32>
    %cst_51 = arith.constant 1.000000e+00 : f32
    %242 = vector.broadcast %cst_51 : f32 to vector<2x32xf32>
    %243 = arith.addf %242, %241 : vector<2x32xf32>
    %244 = arith.divf %242, %243 : vector<2x32xf32>
    %245 = vector.extract_strided_slice %234 {offsets = [0, 32], sizes = [2, 32], strides = [1, 1]} : vector<2x96xf32> to vector<2x32xf32>
    %246 = vector.extract_strided_slice %236 {offsets = [0, 32], sizes = [2, 32], strides = [1, 1]} : vector<2x96xf32> to vector<2x32xf32>
    %247 = arith.addf %245, %246 : vector<2x32xf32>
    %248 = arith.negf %247 : vector<2x32xf32>
    %249 = math.exp %248 : vector<2x32xf32>
    %cst_52 = arith.constant 1.000000e+00 : f32
    %250 = vector.broadcast %cst_52 : f32 to vector<2x32xf32>
    %251 = arith.addf %250, %249 : vector<2x32xf32>
    %252 = arith.divf %250, %251 : vector<2x32xf32>
    %253 = vector.extract_strided_slice %234 {offsets = [0, 64], sizes = [2, 32], strides = [1, 1]} : vector<2x96xf32> to vector<2x32xf32>
    %254 = vector.extract_strided_slice %236 {offsets = [0, 64], sizes = [2, 32], strides = [1, 1]} : vector<2x96xf32> to vector<2x32xf32>
    %255 = arith.addf %254, %6 : vector<2x32xf32>
    %256 = arith.mulf %244, %255 : vector<2x32xf32>
    %257 = arith.addf %253, %256 : vector<2x32xf32>
    %258 = math.tanh %257 : vector<2x32xf32>
    %cst_53 = arith.constant 1.000000e+00 : f32
    %259 = vector.broadcast %cst_53 : f32 to vector<2x32xf32>
    %260 = arith.subf %259, %252 : vector<2x32xf32>
    %261 = arith.mulf %260, %258 : vector<2x32xf32>
    %262 = arith.mulf %252, %231 : vector<2x32xf32>
    %263 = arith.addf %261, %262 : vector<2x32xf32>
    %264 = vector.shape_cast %39 : vector<2x32xf32> to vector<2x1x32xf32>
    %265 = vector.shape_cast %71 : vector<2x32xf32> to vector<2x1x32xf32>
    %266 = vector.shape_cast %103 : vector<2x32xf32> to vector<2x1x32xf32>
    %267 = vector.shape_cast %135 : vector<2x32xf32> to vector<2x1x32xf32>
    %268 = vector.shape_cast %167 : vector<2x32xf32> to vector<2x1x32xf32>
    %269 = vector.shape_cast %199 : vector<2x32xf32> to vector<2x1x32xf32>
    %270 = vector.shape_cast %231 : vector<2x32xf32> to vector<2x1x32xf32>
    %271 = vector.shape_cast %263 : vector<2x32xf32> to vector<2x1x32xf32>
    %272 = tpu.concatenate %264, %265, %266, %267, %268, %269, %270, %271 in 1 : vector<2x1x32xf32>, vector<2x1x32xf32>, vector<2x1x32xf32>, vector<2x1x32xf32>, vector<2x1x32xf32>, vector<2x1x32xf32>, vector<2x1x32xf32>, vector<2x1x32xf32> -> vector<2x8x32xf32>
    %273 = arith.truncf %272 : vector<2x8x32xf32> to vector<2x8x32xbf16>
    %c0_54 = arith.constant 0 : index
    %c0_55 = arith.constant 0 : index
    %c0_56 = arith.constant 0 : index
    %274 = vector.load %arg5[%c0_54, %c0_55, %c0_56] : memref<2x8x32xbf16, #tpu.memory_space<vmem>>, vector<2x8x32xbf16>
    tpu.vector_store %arg5[%c0_54, %c0_55, %c0_56], %273 {strides = array<i32>} : memref<2x8x32xbf16, #tpu.memory_space<vmem>>, vector<2x8x32xbf16>,
    %c0_57 = arith.constant 0 : index
    %c0_58 = arith.constant 0 : index
    %275 = vector.load %arg6[%c0_57, %c0_58] : memref<2x32xf32, #tpu.memory_space<vmem>>, vector<2x32xf32>
    tpu.vector_store %arg6[%c0_57, %c0_58], %263 {strides = array<i32>} : memref<2x32xf32, #tpu.memory_space<vmem>>, vector<2x32xf32>,
    return
  }
  func.func @transform_0(%arg0: i32, %arg1: i32) -> (i32, i32, i32) {
    %c0_i32 = arith.constant 0 : i32
    %c0_i32_0 = arith.constant 0 : i32
    return %arg0, %arg1, %c0_i32 : i32, i32, i32
  }
  func.func @transform_1(%arg0: i32, %arg1: i32) -> (i32, i32) {
    %c0_i32 = arith.constant 0 : i32
    %c0_i32_0 = arith.constant 0 : i32
    %c0_i32_1 = arith.constant 0 : i32
    return %c0_i32, %c0_i32_0 : i32, i32
  }
  func.func @transform_2(%arg0: i32, %arg1: i32) -> (i32, i32) {
    %c0_i32 = arith.constant 0 : i32
    %c0_i32_0 = arith.constant 0 : i32
    %c0_i32_1 = arith.constant 0 : i32
    return %c0_i32, %c0_i32_0 : i32, i32
  }
  func.func @transform_3(%arg0: i32, %arg1: i32) -> (i32, i32, i32) {
    %c0_i32 = arith.constant 0 : i32
    %c0_i32_0 = arith.constant 0 : i32
    return %arg0, %arg1, %c0_i32 : i32, i32, i32
  }
}

module attributes {stable_mosaic.version = 11 : i64} {
  func.func @linear_kernel(%arg0: i32, %arg1: i32, %arg2: i32, %arg3: memref<16x32xbf16, #tpu.memory_space<vmem>>, %arg4: memref<32x16xbf16, #tpu.memory_space<vmem>>, %arg5: memref<1x16xf32, #tpu.memory_space<vmem>>, %arg6: memref<16x16xf32, #tpu.memory_space<vmem>>, %arg7: memref<16x16xf32, #tpu.memory_space<vmem>>) attributes {dimension_semantics = [#tpu.dimension_semantics<parallel>, #tpu.dimension_semantics<parallel>, #tpu.dimension_semantics<arbitrary>], iteration_bounds = array<i64: 1, 1, 1>, scalar_prefetch = 0 : i64, scratch_operands = 1 : i64, tpu.core_type = #tpu.core_type<tc>, window_params = [{transform_indices = @transform_0, window_bounds = array<i64: 16, 32>}, {transform_indices = @transform_1, window_bounds = array<i64: 32, 16>}, {transform_indices = @transform_2, window_bounds = array<i64: 1, 16>}, {transform_indices = @transform_3, window_bounds = array<i64: 16, 16>}]} {
    %c0_i32 = arith.constant 0 : i32
    %0 = arith.cmpi eq, %arg2, %c0_i32 : i32
    %1 = arith.extui %0 : i1 to i32
    %c0_i32_0 = arith.constant 0 : i32
    %2 = arith.cmpi ne, %1, %c0_i32_0 : i32
    scf.if %2 {
      %cst_10 = arith.constant 0.000000e+00 : f32
      %12 = vector.broadcast %cst_10 : f32 to vector<16x16xf32>
      %c0_11 = arith.constant 0 : index
      %c0_12 = arith.constant 0 : index
      %13 = vector.load %arg7[%c0_11, %c0_12] : memref<16x16xf32, #tpu.memory_space<vmem>>, vector<16x16xf32>
      tpu.vector_store %arg7[%c0_11, %c0_12], %12 {strides = array<i32>} : memref<16x16xf32, #tpu.memory_space<vmem>>, vector<16x16xf32>,
    } else {
    }
    %c0 = arith.constant 0 : index
    %c0_1 = arith.constant 0 : index
    %3 = vector.load %arg7[%c0, %c0_1] : memref<16x16xf32, #tpu.memory_space<vmem>>, vector<16x16xf32>
    %c0_2 = arith.constant 0 : index
    %c0_3 = arith.constant 0 : index
    %4 = vector.load %arg3[%c0_2, %c0_3] : memref<16x32xbf16, #tpu.memory_space<vmem>>, vector<16x32xbf16>
    %c0_4 = arith.constant 0 : index
    %c0_5 = arith.constant 0 : index
    %5 = vector.load %arg4[%c0_4, %c0_5] : memref<32x16xbf16, #tpu.memory_space<vmem>>, vector<32x16xbf16>
    %cst = arith.constant dense<0.000000e+00> : vector<16x16xf32>
    %6 = tpu.matmul %4, %5, %cst {dimension_numbers = #tpu.dot_dimension_numbers<[1], [0], [0], [1], [0, 0, 1, 1], [], []>} : vector<16x32xbf16>, vector<32x16xbf16>, vector<16x16xf32> -> vector<16x16xf32>
    %7 = arith.addf %3, %6 : vector<16x16xf32>
    %c0_6 = arith.constant 0 : index
    %c0_7 = arith.constant 0 : index
    %8 = vector.load %arg7[%c0_6, %c0_7] : memref<16x16xf32, #tpu.memory_space<vmem>>, vector<16x16xf32>
    tpu.vector_store %arg7[%c0_6, %c0_7], %7 {strides = array<i32>} : memref<16x16xf32, #tpu.memory_space<vmem>>, vector<16x16xf32>,
    %c0_i32_8 = arith.constant 0 : i32
    %9 = arith.cmpi eq, %arg2, %c0_i32_8 : i32
    %10 = arith.extui %9 : i1 to i32
    %c0_i32_9 = arith.constant 0 : i32
    %11 = arith.cmpi ne, %10, %c0_i32_9 : i32
    scf.if %11 {
      %c0_10 = arith.constant 0 : index
      %c0_11 = arith.constant 0 : index
      %12 = vector.load %arg7[%c0_10, %c0_11] : memref<16x16xf32, #tpu.memory_space<vmem>>, vector<16x16xf32>
      %c0_12 = arith.constant 0 : index
      %c0_13 = arith.constant 0 : index
      %13 = vector.load %arg5[%c0_12, %c0_13] : memref<1x16xf32, #tpu.memory_space<vmem>>, vector<1x16xf32>
      %14 = vector.broadcast %13 : vector<1x16xf32> to vector<16x16xf32>
      %15 = arith.addf %12, %14 : vector<16x16xf32>
      %c0_14 = arith.constant 0 : index
      %c0_15 = arith.constant 0 : index
      %16 = vector.load %arg6[%c0_14, %c0_15] : memref<16x16xf32, #tpu.memory_space<vmem>>, vector<16x16xf32>
      tpu.vector_store %arg6[%c0_14, %c0_15], %15 {strides = array<i32>} : memref<16x16xf32, #tpu.memory_space<vmem>>, vector<16x16xf32>,
    } else {
    }
    return
  }
  func.func @transform_0(%arg0: i32, %arg1: i32, %arg2: i32) -> (i32, i32) {
    %c0_i32 = arith.constant 0 : i32
    return %arg0, %arg2 : i32, i32
  }
  func.func @transform_1(%arg0: i32, %arg1: i32, %arg2: i32) -> (i32, i32) {
    %c0_i32 = arith.constant 0 : i32
    return %arg2, %arg1 : i32, i32
  }
  func.func @transform_2(%arg0: i32, %arg1: i32, %arg2: i32) -> (i32, i32) {
    %c0_i32 = arith.constant 0 : i32
    %c0_i32_0 = arith.constant 0 : i32
    return %c0_i32, %arg1 : i32, i32
  }
  func.func @transform_3(%arg0: i32, %arg1: i32, %arg2: i32) -> (i32, i32) {
    %c0_i32 = arith.constant 0 : i32
    return %arg0, %arg1 : i32, i32
  }
}

</mosaic_0001>

<bundles_post_ra>
// kernel: rnnlm_forward.3
= control target key start
LH: loop header
LB: loop body
LE: loop exit
PB: predicated region body
PF: predicated region fallthrough
CT: control target
= control target key end

     0   :  { %vm19_vm0 = vcmask 785408   ;;  %v108_v1 = vmov 0.0   ;;  %vm47_vm1 = vcmask 261120   ;;  %vm83_vm2 = vcmask 781312   ;;  %s151_s1 = inlined_call_operand.vmem [shape: bf16[32,96], index: 1, kind: input, shape index: {}]   ;;  %s152_s2 = inlined_call_operand.vmem [shape: f32[1,96], index: 2, kind: input, shape index: {}]   ;;  %s153_s0 = inlined_call_operand.vmem [shape: bf16[16,32], index: 0, kind: input, shape index: {}]   ;;  %s154_s3 = inlined_call_operand.vmem [shape: bf16[16,96], index: 3, kind: output, shape index: {}]  }
   0x1   :  { %v105_v0 = vld [vmem:[%s151_s1 + $0x8] sm:$0xff]  ;;  %20 = vst.msk [vmem:[#allocation2] sm:$0xff] %vm19_vm0, %v108_v1  ;;  %v104_v2 = vld [vmem:[%s151_s1] sm:$0xff] }
   0x2   :  { %21 = vst.msk [vmem:[#allocation2 + $0x8] sm:$0xff] %vm19_vm0, %v108_v1  ;;  %57 = vmatpush.bf16.msra.mxu0 %v105_v0  ;;  %v103_v3 = vld [vmem:[%s153_s0] sm:$0xff] }
   0x3   :  { %v107_v8 = vld [vmem:[%s152_s2] ss:$0 sm:$0xff] }
   0x6   :  { %58 = vmatpush.bf16.msra.mxu0 %v104_v2 }
   0x8   :  { %v22_v4 = vld [vmem:[#allocation2] sm:$0xff] }
   0x9   :  { %102 = vmatmul.msk.bf16.vlgmr.msra.gmra.mxu0 %vm47_vm1, %v103_v3  ;;  %v23_v7 = vld [vmem:[#allocation2 + $0x8] sm:$0xff] }
  0x86   :  { %v60_v5 = vpop.f32.mrf.mxu0 }
  0x87   :  { %v65_v6 = vadd.f32 %v60_v5, %v22_v4 }
  0x89   :  { %68 = vst.msk [vmem:[#allocation2] sm:$0xff] %vm19_vm0, %v65_v6 }
  0x8e   :  { %v62_v9 = vpop.f32.mrf.mxu0 }
  0x8f   :  { %v66_v10 = vadd.f32 %v62_v9, %v23_v7 }
  0x90   :  { %v73_v11 = vld [vmem:[#allocation2] sm:$0xff] }
  0x91   :  { %v79_v12 = vadd.f32 %v107_v8, %v73_v11  ;;  %69 = vst.msk [vmem:[#allocation2 + $0x8] sm:$0xff] %vm19_vm0, %v66_v10 }
  0x93   :  { %v81_v13 = vpack.c.bf16 %v79_v12, %v79_v12 }
  0x95   :  { %84 = vst.msk [vmem:[%s154_s3] sm:$0xf] %vm83_vm2, %v81_v13 }
  0x98   :  { %v74_v14 = vld [vmem:[#allocation2 + $0x8] sm:$0xff] }
  0x99   :  { %v80_v15 = vadd.f32 %v107_v8, %v74_v14 }
  0x9b   :  { %v82_v16 = vpack.c.bf16 %v80_v15, %v80_v15 }
  0x9d   :  { %85 = vst.msk [vmem:[%s154_s3 + $0x4] sm:$0xf] %vm83_vm2, %v82_v16 }

// kernel: rnnlm_forward.5
= control target key start
LH: loop header
LB: loop body
LE: loop exit
PB: predicated region body
PF: predicated region fallthrough
CT: control target
= control target key end

     0   :  { %vm19_vm0 = vcmask 130048   ;;  %v105_v1 = vmov 0.0   ;;  %vm47_vm1 = vcmask 261120   ;;  %s150_s1 = inlined_call_operand.vmem [shape: bf16[32,16], index: 1, kind: input, shape index: {}]   ;;  %s151_s2 = inlined_call_operand.vmem [shape: f32[1,16], index: 2, kind: input, shape index: {}]   ;;  %s152_s0 = inlined_call_operand.vmem [shape: bf16[16,32], index: 0, kind: input, shape index: {}]   ;;  %s153_s3 = inlined_call_operand.vmem [shape: f32[16,16], index: 3, kind: output, shape index: {}]  }
   0x1   :  { %v102_v0 = vld [vmem:[%s150_s1 + $0x8] sm:$0xff]  ;;  %20 = vst.msk [vmem:[#allocation2] sm:$0xff] %vm19_vm0, %v105_v1  ;;  %v101_v2 = vld [vmem:[%s150_s1] sm:$0xff] }
   0x2   :  { %21 = vst.msk [vmem:[#allocation2 + $0x8] sm:$0xff] %vm19_vm0, %v105_v1  ;;  %57 = vmatpush.bf16.msra.mxu0 %v102_v0  ;;  %v100_v3 = vld [vmem:[%s152_s0] sm:$0xff] }
   0x3   :  { %v104_v8 = vld [vmem:[%s151_s2] ss:$0 sm:$0xff] }
   0x6   :  { %58 = vmatpush.bf16.msra.mxu0 %v101_v2 }
   0x8   :  { %v22_v4 = vld [vmem:[#allocation2] sm:$0xff] }
   0x9   :  { %99 = vmatmul.msk.bf16.vlgmr.msra.gmra.mxu0 %vm47_vm1, %v100_v3  ;;  %v23_v7 = vld [vmem:[#allocation2 + $0x8] sm:$0xff] }
  0x86   :  { %v60_v5 = vpop.f32.mrf.mxu0 }
  0x87   :  { %v65_v6 = vadd.f32 %v60_v5, %v22_v4 }
  0x89   :  { %68 = vst.msk [vmem:[#allocation2] sm:$0xff] %vm19_vm0, %v65_v6 }
  0x8e   :  { %v62_v9 = vpop.f32.mrf.mxu0 }
  0x8f   :  { %v66_v10 = vadd.f32 %v62_v9, %v23_v7 }
  0x90   :  { %v73_v11 = vld [vmem:[#allocation2] sm:$0xff] }
  0x91   :  { %v79_v12 = vadd.f32 %v104_v8, %v73_v11  ;;  %69 = vst.msk [vmem:[#allocation2 + $0x8] sm:$0xff] %vm19_vm0, %v66_v10 }
  0x93   :  { %81 = vst.msk [vmem:[%s153_s3] sm:$0xff] %vm19_vm0, %v79_v12 }
  0x98   :  { %v74_v13 = vld [vmem:[#allocation2 + $0x8] sm:$0xff] }
  0x99   :  { %v80_v14 = vadd.f32 %v104_v8, %v74_v13 }
  0x9b   :  { %82 = vst.msk [vmem:[%s153_s3 + $0x8] sm:$0xff] %vm19_vm0, %v80_v14 }

// kernel: rnnlm_forward.4
= control target key start
LH: loop header
LB: loop body
LE: loop exit
PB: predicated region body
PF: predicated region fallthrough
CT: control target
= control target key end

     0   :  { %vm19_vm0 = vcmask 254976   ;;  %v1185_v1 = vmov 0.0   ;;  %s1186_s18 = smov 64   ;;  %vm46_vm1 = vcmask 261120   ;;  %s1188_s22 = smov 96   ;;  %vm164_vm10 = vcmask 1041409   ;;  %s1485_s1 = inlined_call_operand.vmem [shape: bf16[32,96], index: 1, kind: input, shape index: {}]   ;;  %s1486_s2 = inlined_call_operand.vmem [shape: f32[1,32], index: 2, kind: input, shape index: {}]   ;;  %s1487_s0 = inlined_call_operand.vmem [shape: bf16[2,8,96], index: 0, kind: input, shape index: {}]   ;;  %s1488_s3 = inlined_call_operand.vmem [shape: bf16[2,8,32], index: 3, kind: output, shape index: {}]  }
   0x1   :  { %v1083_v0 = vld [vmem:[%s1485_s1 + $0x8] sm:$0xff]  ;;  %20 = vst.msk [vmem:[#allocation2] sm:$0x3] %vm19_vm0, %v1185_v1  ;;  %v1088_v2 = vld [vmem:[%s1486_s2] ss:$0 sm:$0xff] }
   0x2   :  { %56 = vmatpush.bf16.msra.mxu0 %v1083_v0  ;;  %v1082_v3 = vld [vmem:[%s1485_s1] sm:$0xff]  ;;  %178 = vmatpush.bf16.msra.mxu1 %v1083_v0  ;;  %s1187_s1 = smov 32  }
   0x3   :  { %107 = vrot.lane.b32.xlu0 %v1088_v2, %s1186_s18  ;;  %298 = vmatpush.bf16.msra.mxu2 %v1083_v0  ;;  %v29_v12 = vld [vmem:[%s1487_s0] sm:$0x1]  ;;  %v30_v13 = vld [vmem:[%s1487_s0 + $0x4] sm:$0x1] }
   0x4   :  { %417 = vmatpush.bf16.msra.mxu3 %v1083_v0  ;;  %v1237_v14 = vunpack.c.l.bf16 %v29_v12  ;;  %v1239_v15 = vunpack.c.l.bf16 %v30_v13 }
   0x6   :  { %57 = vmatpush.bf16.msra.mxu0 %v1082_v3  ;;  %179 = vmatpush.bf16.msra.mxu1 %v1082_v3 }
   0x7   :  { %299 = vmatpush.bf16.msra.mxu2 %v1082_v3 }
   0x8   :  { %v1219_v4 = vld [vmem:[#allocation2] sm:$0x3]  ;;  %418 = vmatpush.bf16.msra.mxu3 %v1082_v3 }
   0x9   :  { %v33_v5 = vpack.c.bf16 %v1219_v4, %v1219_v4  ;;  %v146_v11 = vrot.slane %v1219_v4, 1 }
   0xa   :  { %540 = vmatpush.bf16.msrb.mxu0 %v1083_v0  ;;  %659 = vmatpush.bf16.msrb.mxu1 %v1083_v0 }
   0xb   :  { %782 = vmatpush.bf16.msrb.mxu2 %v1083_v0  ;;  %1058 = vmatmul.msk.bf16.vlgmr.msra.gmra.mxu0 %vm46_vm1, %v33_v5 }
   0xc   :  { %901 = vmatpush.bf16.msrb.mxu3 %v1083_v0 }
   0xe   :  { %541 = vmatpush.bf16.msrb.mxu0 %v1082_v3  ;;  %660 = vmatpush.bf16.msrb.mxu1 %v1082_v3 }
   0xf   :  { %783 = vmatpush.bf16.msrb.mxu2 %v1082_v3 }
  0x10   :  { %902 = vmatpush.bf16.msrb.mxu3 %v1082_v3 }
  0x75   :  { %v1224_v6 = vpop.permute.xlu0 %107 }
  0x88   :  { %v59_v7 = vpop.f32.mrf.mxu0 }
  0x89   :  { %v110_v8 = vadd.f32 %v1224_v6, %v59_v7  ;;  %v64_v16 = vrot.slane %v59_v7, 1  ;;  %v67_v17 = vadd.f32 %v59_v7, %v1237_v14 }
  0x8b   :  { %113 = vrot.lane.b32.xlu1 %v110_v8, %s1186_s18  ;;  %v112_v9 = vrot.slane %v110_v8, 1  ;;  %v68_v18 = vadd.f32 %v64_v16, %v1239_v15  ;;  %v1059_v19 = vmul.f32 -1.442695, %v67_v17 }
  0x8d   :  { %115 = vrot.lane.b32.xlu0 %v112_v9, %s1186_s18  ;;  %v1060_v20 = vmul.f32 -1.442695, %v68_v18  ;;  %1089 = vpow2.f32 %v1059_v19 }
  0x8f   :  { %1091 = vpow2.f32 %v1060_v20 }
  0x90   :  { %v61_v10 = vpop.f32.mrf.mxu0 }
  0x93   :  { %v1090_v21 = vpop.eup %1089 }
  0x94   :  { %v75_v23 = vadd.f32 1.0, %v1090_v21 }
  0x95   :  { %149 = vrot.lane.b32.xlu0 %v146_v11, %s1187_s1  ;;  %v1092_v22 = vpop.eup %1091 }
  0x96   :  { %v76_v24 = vadd.f32 1.0, %v1092_v22  ;;  %1093 = vrcp.f32 %v75_v23  ;;  %v88_v34 = vand.u32 2147483648, %v75_v23  ;;  %vm82_vm3 = vweird.f32 %v75_v23 }
  0x97   :  { %v86_v35 = vand.u32 2147483647, %v75_v23 }
  0x98   :  { %1095 = vrcp.f32 %v76_v24  ;;  %v103_v37 = vand.u32 2147483648, %v76_v24  ;;  %vm97_vm6 = vweird.f32 %v76_v24  ;;  %v101_v39 = vand.u32 2147483647, %v76_v24 }
  0x99   :  { %v89_v40 = vor.u32 1.1754944e-38, %v88_v34  ;;  %vm87_vm8 = vcmp.eq.f32.partialorder %v86_v35, 8.507059e+37 }
  0x9a   :  { %v104_v44 = vor.u32 1.1754944e-38, %v103_v37  ;;  %vm102_vm9 = vcmp.eq.f32.partialorder %v101_v39, 8.507059e+37 }
  0x9c   :  { %v1094_v25 = vpop.eup %1093 }
  0x9d   :  { %v78_v27 = vmul.f32 %v1094_v25, %v75_v23  ;;  %vm83_vm2 = vweird.f32 %v1094_v25 }
  0x9e   :  { %v1096_v26 = vpop.eup %1095  ;;  %vm84_vm5 = vmor %vm82_vm3, %vm83_vm2 }
  0x9f   :  { %v93_v28 = vmul.f32 %v1096_v26, %v76_v24  ;;  %v79_v29 = vsub.f32 1.0, %v78_v27  ;;  %vm98_vm4 = vweird.f32 %v1096_v26 }
  0xa0   :  { %vm99_vm7 = vmor %vm97_vm6, %vm98_vm4 }
  0xa1   :  { %v94_v30 = vsub.f32 1.0, %v93_v28  ;;  %v80_v31 = vmul.f32 %v1094_v25, %v79_v29 }
  0xa3   :  { %v95_v32 = vmul.f32 %v1096_v26, %v94_v30  ;;  %v81_v33 = vadd.f32 %v1094_v25, %v80_v31 }
  0xa5   :  { %v96_v36 = vadd.f32 %v1096_v26, %v95_v32  ;;  %v85_v38 = vsel %vm84_vm5, %v1094_v25, %v81_v33 }
  0xa6   :  { %v90_v43 = vsel %vm87_vm8, %v89_v40, %v85_v38 }
  0xa7   :  { %v100_v41 = vsel %vm99_vm7, %v1096_v26, %v96_v36  ;;  %v133_v62 = vsub.f32 1.0, %v90_v43 }
  0xa8   :  { %v105_v47 = vsel %vm102_vm9, %v104_v44, %v100_v41 }
  0xa9   :  { %v134_v56 = vsub.f32 1.0, %v105_v47 }
  0xfd   :  { %v114_v42 = vpop.permute.xlu1 %113 }
  0xfe   :  { %v119_v45 = vmul.f32 %v114_v42, %v90_v43 }
  0xff   :  { %v116_v46 = vpop.permute.xlu0 %115 }
 0x100   :  { %v120_v48 = vmul.f32 %v116_v46, %v105_v47  ;;  %123 = vrot.lane.b32.xlu2 %v119_v45, %s1186_s18 }
 0x102   :  { %125 = vrot.lane.b32.xlu1 %v120_v48, %s1186_s18 }
 0x107   :  { %v150_v55 = vpop.permute.xlu0 %149 }
 0x108   :  { %v154_v58 = vmul.f32 %v150_v55, %v105_v47 }
 0x15a   :  { %v124_v49 = vpop.permute.xlu2 %123 }
 0x15b   :  { %v129_v50 = vadd.f32 %v124_v49, %v1237_v14 }
 0x15d   :  { %1097 = vtanh.f32 %v129_v50 }
 0x163   :  { %v1098_v51 = vpop.eup %1097 }
 0x164   :  { %137 = vrot.lane.b32.xlu1 %v1098_v51, %s1188_s22 }
 0x174   :  { %v126_v52 = vpop.permute.xlu1 %125 }
 0x175   :  { %v130_v53 = vadd.f32 %v126_v52, %v1239_v15 }
 0x177   :  { %1099 = vtanh.f32 %v130_v53 }
 0x17d   :  { %v1100_v54 = vpop.eup %1099 }
 0x17e   :  { %139 = vrot.lane.b32.xlu2 %v1100_v54, %s1188_s22 }
 0x186   :  { %147 = vrot.lane.b32.xlu2 %v1219_v4, %s1187_s1 }
 0x1d6   :  { %v138_v61 = vpop.permute.xlu1 %137 }
 0x1d7   :  { %v143_v1 = vmul.f32 %v138_v61, %v133_v62 }
 0x1d8   :  { %v140_v57 = vpop.permute.xlu2 %139 }
 0x1d9   :  { %v144_v59 = vmul.f32 %v140_v57, %v134_v56 }
 0x1db   :  { %v1251_v60 = vadd.f32 %v154_v58, %v144_v59 }
 0x1dd   :  { %v158_v63 = vpack.c.bf16 %v1251_v60, %v1251_v60  ;;  %v267_v58 = vrot.slane %v1251_v60, 7 }
 0x1df   :  { %v162_v3 = vunpack.c.l.b16 %v158_v63 }
 0x1e0   :  { %v148_v0 = vpop.permute.xlu2 %147 }
 0x1e1   :  { %v153_v2 = vmul.f32 %v148_v0, %v90_v43  ;;  %v163_v7 = vrot.slane %v162_v3, 7 }
 0x1e3   :  { %v1255_v5 = vadd.f32 %v153_v2, %v143_v1 }
 0x1e5   :  { %v157_v4 = vpack.c.bf16 %v1255_v5, %v1255_v5 }
 0x1e7   :  { %v161_v8 = vunpack.c.l.b16 %v157_v4 }
 0x1e9   :  { %v165_v9 = vsel %vm164_vm10, %v163_v7, %v161_v8 }
 0x1ea   :  { %v166_v10 = vpack.c.b16 %v165_v9, %v165_v9 }
 0x1ec   :  { %167 = vrot.lane.b32.xlu0 %v166_v10, %s1188_s22 }
 0x25e   :  { %v168_v11 = vpop.permute.xlu0 %167 }
 0x25f   :  { %1061 = vmatmul.msk.bf16.vlgmr.msra.gmra.mxu1 %vm46_vm1, %v168_v11 }
 0x2dc   :  { %v181_v12 = vpop.f32.mrf.mxu1 }
 0x2dd   :  { %v229_v13 = vadd.f32 %v181_v12, %v1224_v6  ;;  %v190_v18 = vadd.f32 %v181_v12, %v1239_v15  ;;  %v186_v22 = vrot.slane %v181_v12, 7 }
 0x2df   :  { %234 = vrot.lane.b32.xlu2 %v229_v13, %s1186_s18  ;;  %v231_v16 = vrot.slane %v229_v13, 7  ;;  %v1063_v19 = vmul.f32 -1.442695, %v190_v18  ;;  %v189_v23 = vadd.f32 %v186_v22, %v1237_v14 }
 0x2e1   :  { %232 = vrot.lane.b32.xlu1 %v231_v16, %s1186_s18  ;;  %1101 = vpow2.f32 %v1063_v19  ;;  %v1062_v25 = vmul.f32 -1.442695, %v189_v23  ;;  %v274_v16 = vld [vmem:[%s1487_s0] sm:$0x2] }
 0x2e4   :  { %v183_v17 = vpop.f32.mrf.mxu1 }
 0x2e5   :  { %v1289_v17 = vunpack.c.l.bf16 %v274_v16 }
 0x2e7   :  { %v1102_v20 = vpop.eup %1101 }
 0x2e8   :  { %v198_v21 = vadd.f32 1.0, %v1102_v20 }
 0x2ea   :  { %1103 = vrcp.f32 %v198_v21  ;;  %v225_v32 = vand.u32 2147483648, %v198_v21  ;;  %vm219_vm12 = vweird.f32 %v198_v21  ;;  %v223_v33 = vand.u32 2147483647, %v198_v21 }
 0x2eb   :  { %1105 = vpow2.f32 %v1062_v25 }
 0x2ec   :  { %v226_v35 = vor.u32 1.1754944e-38, %v225_v32  ;;  %vm224_vm14 = vcmp.eq.f32.partialorder %v223_v33, 8.507059e+37 }
 0x2f0   :  { %v1104_v24 = vpop.eup %1103 }
 0x2f1   :  { %v215_v26 = vmul.f32 %v1104_v24, %v198_v21  ;;  %v1106_v29 = vpop.eup %1105  ;;  %vm220_vm11 = vweird.f32 %v1104_v24 }
 0x2f2   :  { %v197_v31 = vadd.f32 1.0, %v1106_v29  ;;  %vm221_vm13 = vmor %vm219_vm12, %vm220_vm11 }
 0x2f3   :  { %v216_v27 = vsub.f32 1.0, %v215_v26 }
 0x2f4   :  { %1107 = vrcp.f32 %v197_v31  ;;  %v210_v44 = vand.u32 2147483648, %v197_v31  ;;  %vm204_vm0 = vweird.f32 %v197_v31  ;;  %v208_v45 = vand.u32 2147483647, %v197_v31 }
 0x2f5   :  { %v217_v28 = vmul.f32 %v1104_v24, %v216_v27 }
 0x2f6   :  { %v211_v47 = vor.u32 1.1754944e-38, %v210_v44  ;;  %vm209_vm3 = vcmp.eq.f32.partialorder %v208_v45, 8.507059e+37 }
 0x2f7   :  { %v218_v30 = vadd.f32 %v1104_v24, %v217_v28 }
 0x2f9   :  { %v222_v34 = vsel %vm221_vm13, %v1104_v24, %v218_v30  ;;  %vm999_vm13 = vcmask 1040384  }
 0x2fa   :  { %v227_v37 = vsel %vm224_vm14, %v226_v35, %v222_v34  ;;  %v1108_v39 = vpop.eup %1107  ;;  %vm1002_vm14 = vcmask 1041408  }
 0x2fb   :  { %v200_v40 = vmul.f32 %v1108_v39, %v197_v31  ;;  %vm205_vm15 = vweird.f32 %v1108_v39  ;;  %v253_v57 = vsub.f32 1.0, %v227_v37  ;;  %v271_v61 = vmul.f32 %v267_v58, %v227_v37 }
 0x2fc   :  { %vm206_vm2 = vmor %vm204_vm0, %vm205_vm15 }
 0x2fd   :  { %v201_v41 = vsub.f32 1.0, %v200_v40  ;;  %v275_v40 = vld [vmem:[%s1487_s0 + $0x4] sm:$0x2] }
 0x2ff   :  { %v202_v42 = vmul.f32 %v1108_v39, %v201_v41  ;;  %v1299_v41 = vunpack.c.l.bf16 %v275_v40 }
 0x301   :  { %v203_v43 = vadd.f32 %v1108_v39, %v202_v42 }
 0x303   :  { %v207_v46 = vsel %vm206_vm2, %v1108_v39, %v203_v43 }
 0x304   :  { %v212_v49 = vsel %vm209_vm3, %v211_v47, %v207_v46 }
 0x305   :  { %v252_v63 = vsub.f32 1.0, %v212_v49 }
 0x339   :  { %v235_v36 = vpop.permute.xlu2 %234 }
 0x33a   :  { %v239_v38 = vmul.f32 %v235_v36, %v227_v37 }
 0x33c   :  { %244 = vrot.lane.b32.xlu1 %v239_v38, %s1186_s18 }
 0x353   :  { %v233_v48 = vpop.permute.xlu1 %232 }
 0x354   :  { %v238_v50 = vmul.f32 %v233_v48, %v212_v49 }
 0x356   :  { %242 = vrot.lane.b32.xlu0 %v238_v50, %s1186_s18 }
 0x3ae   :  { %v245_v51 = vpop.permute.xlu1 %244 }
 0x3af   :  { %v249_v52 = vadd.f32 %v245_v51, %v1239_v15  ;;  %v266_v15 = vrot.slane %v1255_v5, 7 }
 0x3b1   :  { %1109 = vtanh.f32 %v249_v52  ;;  %v270_v2 = vmul.f32 %v266_v15, %v212_v49 }
 0x3b7   :  { %v1110_v53 = vpop.eup %1109 }
 0x3b8   :  { %258 = vrot.lane.b32.xlu0 %v1110_v53, %s1188_s22 }
 0x3c8   :  { %v243_v54 = vpop.permute.xlu0 %242 }
 0x3c9   :  { %v248_v55 = vadd.f32 %v243_v54, %v1237_v14 }
 0x3cb   :  { %1111 = vtanh.f32 %v248_v55 }
 0x3d1   :  { %v1112_v56 = vpop.eup %1111 }
 0x3d2   :  { %256 = vrot.lane.b32.xlu2 %v1112_v56, %s1188_s22 }
 0x42a   :  { %v259_v59 = vpop.permute.xlu0 %258 }
 0x42b   :  { %v263_v62 = vmul.f32 %v259_v59, %v253_v57 }
 0x42c   :  { %v257_v0 = vpop.permute.xlu2 %256 }
 0x42d   :  { %v1275_v1 = vadd.f32 %v271_v61, %v263_v62  ;;  %v262_v3 = vmul.f32 %v257_v0, %v252_v63 }
 0x42f   :  { %v1277_v4 = vadd.f32 %v270_v2, %v262_v3  ;;  %v279_v14 = vpack.c.bf16 %v1275_v1, %v1275_v1 }
 0x431   :  { %v278_v7 = vpack.c.bf16 %v1277_v4, %v1277_v4  ;;  %v283_v9 = vunpack.c.l.b16 %v279_v14  ;;  %v388_v37 = vrot.slane %v1277_v4, 7 }
 0x433   :  { %v282_v8 = vunpack.c.l.b16 %v278_v7  ;;  %v389_v7 = vrot.slane %v1275_v1, 7 }
 0x435   :  { %v284_v10 = vrot.slane %v282_v8, 1 }
 0x437   :  { %v285_v11 = vsel %vm164_vm10, %v283_v9, %v284_v10 }
 0x438   :  { %v286_v12 = vpack.c.b16 %v285_v11, %v285_v11 }
 0x43a   :  { %287 = vrot.lane.b32.xlu1 %v286_v12, %s1188_s22 }
 0x4ac   :  { %v288_v13 = vpop.permute.xlu1 %287 }
 0x4ad   :  { %1064 = vmatmul.msk.bf16.vlgmr.msra.gmra.mxu2 %vm46_vm1, %v288_v13 }
 0x530   :  { %v301_v18 = vpop.f32.mrf.mxu2 }
 0x531   :  { %v306_v19 = vrot.slane %v301_v18, 6  ;;  %v350_v20 = vadd.f32 %v301_v18, %v1224_v6  ;;  %v307_v42 = vrot.slane %v301_v18, 7  ;;  %v1001_v18 = vsel %vm999_vm13, %v1251_v60, %v1275_v1 }
 0x533   :  { %v310_v21 = vadd.f32 %v306_v19, %v1289_v17  ;;  %v353_v22 = vrot.slane %v350_v20, 7  ;;  %v352_v23 = vrot.slane %v350_v20, 6  ;;  %v311_v43 = vadd.f32 %v307_v42, %v1299_v41 }
 0x534   :  { %v1000_v20 = vsel %vm999_vm13, %v1255_v5, %v1277_v4 }
 0x535   :  { %v1065_v24 = vmul.f32 -1.442695, %v310_v21  ;;  %356 = vrot.lane.b32.xlu0 %v353_v22, %s1186_s18  ;;  %354 = vrot.lane.b32.xlu2 %v352_v23, %s1186_s18  ;;  %v1066_v44 = vmul.f32 -1.442695, %v311_v43 }
 0x537   :  { %1113 = vpow2.f32 %v1065_v24 }
 0x538   :  { %v303_v25 = vpop.f32.mrf.mxu2 }
 0x53d   :  { %v1114_v26 = vpop.eup %1113 }
 0x53e   :  { %v318_v27 = vadd.f32 1.0, %v1114_v26 }
 0x540   :  { %1115 = vrcp.f32 %v318_v27  ;;  %v331_v31 = vand.u32 2147483648, %v318_v27  ;;  %v329_v33 = vand.u32 2147483647, %v318_v27  ;;  %vm325_vm5 = vweird.f32 %v318_v27 }
 0x541   :  { %1117 = vpow2.f32 %v1066_v44 }
 0x542   :  { %v332_v35 = vor.u32 1.1754944e-38, %v331_v31  ;;  %vm330_vm7 = vcmp.eq.f32.partialorder %v329_v33, 8.507059e+37 }
 0x546   :  { %v1116_v28 = vpop.eup %1115 }
 0x547   :  { %v321_v29 = vmul.f32 %v1116_v28, %v318_v27  ;;  %vm326_vm4 = vweird.f32 %v1116_v28  ;;  %v1118_v45 = vpop.eup %1117 }
 0x548   :  { %vm327_vm6 = vmor %vm325_vm5, %vm326_vm4  ;;  %v319_v46 = vadd.f32 1.0, %v1118_v45 }
 0x549   :  { %v322_v30 = vsub.f32 1.0, %v321_v29 }
 0x54a   :  { %1119 = vrcp.f32 %v319_v46  ;;  %v346_v54 = vand.u32 2147483648, %v319_v46  ;;  %vm340_vm9 = vweird.f32 %v319_v46  ;;  %v344_v55 = vand.u32 2147483647, %v319_v46 }
 0x54b   :  { %v323_v32 = vmul.f32 %v1116_v28, %v322_v30 }
 0x54c   :  { %v347_v57 = vor.u32 1.1754944e-38, %v346_v54  ;;  %vm345_vm12 = vcmp.eq.f32.partialorder %v344_v55, 8.507059e+37 }
 0x54d   :  { %v324_v34 = vadd.f32 %v1116_v28, %v323_v32 }
 0x54f   :  { %v328_v36 = vsel %vm327_vm6, %v1116_v28, %v324_v34 }
 0x550   :  { %v333_v38 = vsel %vm330_vm7, %v332_v35, %v328_v36  ;;  %v1120_v49 = vpop.eup %1119 }
 0x551   :  { %v392_v39 = vmul.f32 %v388_v37, %v333_v38  ;;  %v336_v50 = vmul.f32 %v1120_v49, %v319_v46  ;;  %vm341_vm8 = vweird.f32 %v1120_v49  ;;  %v374_v8 = vsub.f32 1.0, %v333_v38 }
 0x552   :  { %vm342_vm11 = vmor %vm340_vm9, %vm341_vm8  ;;  %vm1005_vm8 = vcmask 1042432  }
 0x553   :  { %v337_v51 = vsub.f32 1.0, %v336_v50 }
 0x555   :  { %v338_v52 = vmul.f32 %v1120_v49, %v337_v51 }
 0x557   :  { %v339_v53 = vadd.f32 %v1120_v49, %v338_v52 }
 0x559   :  { %v343_v56 = vsel %vm342_vm11, %v1120_v49, %v339_v53 }
 0x55a   :  { %v348_v59 = vsel %vm345_vm12, %v347_v57, %v343_v56 }
 0x55b   :  { %v375_v14 = vsub.f32 1.0, %v348_v59  ;;  %v393_v11 = vmul.f32 %v389_v7, %v348_v59 }
 0x58f   :  { %v355_v47 = vpop.permute.xlu2 %354 }
 0x590   :  { %v360_v48 = vmul.f32 %v355_v47, %v333_v38 }
 0x592   :  { %364 = vrot.lane.b32.xlu1 %v360_v48, %s1186_s18 }
 0x5a7   :  { %v357_v58 = vpop.permute.xlu0 %356 }
 0x5a8   :  { %v361_v61 = vmul.f32 %v357_v58, %v348_v59 }
 0x5aa   :  { %366 = vrot.lane.b32.xlu2 %v361_v61, %s1186_s18 }
 0x604   :  { %v367_v62 = vpop.permute.xlu2 %366  ;;  %v365_v63 = vpop.permute.xlu1 %364 }
 0x605   :  { %v371_v15 = vadd.f32 %v367_v62, %v1299_v41  ;;  %v370_v0 = vadd.f32 %v365_v63, %v1289_v17 }
 0x607   :  { %1121 = vtanh.f32 %v371_v15 }
 0x608   :  { %1123 = vtanh.f32 %v370_v0 }
 0x60d   :  { %v1122_v2 = vpop.eup %1121 }
 0x60e   :  { %v1124_v3 = vpop.eup %1123  ;;  %380 = vrot.lane.b32.xlu1 %v1122_v2, %s1188_s22 }
 0x60f   :  { %378 = vrot.lane.b32.xlu0 %v1124_v3, %s1188_s22 }
 0x680   :  { %v381_v9 = vpop.permute.xlu1 %380 }
 0x681   :  { %v379_v10 = vpop.permute.xlu0 %378  ;;  %v385_v12 = vmul.f32 %v381_v9, %v375_v14 }
 0x682   :  { %v384_v13 = vmul.f32 %v379_v10, %v374_v8 }
 0x683   :  { %v1309_v16 = vadd.f32 %v393_v11, %v385_v12 }
 0x684   :  { %v1313_v19 = vadd.f32 %v392_v39, %v384_v13 }
 0x685   :  { %v397_v21 = vpack.c.bf16 %v1309_v16, %v1309_v16  ;;  %v1320_v22 = vsel %vm1002_vm14, %v1001_v18, %v1309_v16 }
 0x686   :  { %v396_v23 = vpack.c.bf16 %v1313_v19, %v1313_v19  ;;  %v1325_v24 = vsel %vm1002_vm14, %v1000_v20, %v1313_v19  ;;  %v507_v18 = vrot.slane %v1313_v19, 7 }
 0x687   :  { %v401_v25 = vunpack.c.l.b16 %v397_v21  ;;  %v508_v21 = vrot.slane %v1309_v16, 7 }
 0x688   :  { %v400_v26 = vunpack.c.l.b16 %v396_v23 }
 0x689   :  { %v403_v60 = vrot.slane %v401_v25, 1 }
 0x68a   :  { %v402_v1 = vrot.slane %v400_v26, 2 }
 0x68c   :  { %v404_v27 = vsel %vm164_vm10, %v403_v60, %v402_v1 }
 0x68d   :  { %v405_v28 = vpack.c.b16 %v404_v27, %v404_v27 }
 0x68f   :  { %406 = vrot.lane.b32.xlu2 %v405_v28, %s1188_s22 }
 0x6e9   :  { %v407_v5 = vpop.permute.xlu2 %406 }
 0x6ea   :  { %1067 = vmatmul.msk.bf16.vlgmr.msra.gmra.mxu3 %vm46_vm1, %v407_v5 }
 0x76d   :  { %v420_v4 = vpop.f32.mrf.mxu3 }
 0x76e   :  { %v469_v29 = vadd.f32 %v420_v4, %v1224_v6  ;;  %v425_v33 = vrot.slane %v420_v4, 5  ;;  %v426_v34 = vrot.slane %v420_v4, 6 }
 0x770   :  { %v472_v30 = vrot.slane %v469_v29, 6  ;;  %v471_v31 = vrot.slane %v469_v29, 5  ;;  %v429_v35 = vadd.f32 %v425_v33, %v1289_v17  ;;  %v430_v36 = vadd.f32 %v426_v34, %v1299_v41 }
 0x772   :  { %475 = vrot.lane.b32.xlu1 %v472_v30, %s1186_s18  ;;  %473 = vrot.lane.b32.xlu0 %v471_v31, %s1186_s18  ;;  %v1068_v37 = vmul.f32 -1.442695, %v429_v35  ;;  %v1069_v38 = vmul.f32 -1.442695, %v430_v36 }
 0x774   :  { %1125 = vpow2.f32 %v1068_v37 }
 0x775   :  { %v422_v32 = vpop.f32.mrf.mxu3  ;;  %1127 = vpow2.f32 %v1069_v38 }
 0x77a   :  { %v1126_v39 = vpop.eup %1125 }
 0x77b   :  { %v1128_v40 = vpop.eup %1127  ;;  %v437_v42 = vadd.f32 1.0, %v1126_v39 }
 0x77c   :  { %v438_v43 = vadd.f32 1.0, %v1128_v40 }
 0x77d   :  { %1129 = vrcp.f32 %v437_v42  ;;  %vm444_vm2 = vweird.f32 %v437_v42  ;;  %v450_v55 = vand.u32 2147483648, %v437_v42  ;;  %v448_v57 = vand.u32 2147483647, %v437_v42 }
 0x77e   :  { %1131 = vrcp.f32 %v438_v43  ;;  %v465_v54 = vand.u32 2147483648, %v438_v43  ;;  %vm459_vm3 = vweird.f32 %v438_v43  ;;  %v463_v56 = vand.u32 2147483647, %v438_v43 }
 0x77f   :  { %v451_v62 = vor.u32 1.1754944e-38, %v450_v55  ;;  %vm449_vm7 = vcmp.eq.f32.partialorder %v448_v57, 8.507059e+37 }
 0x780   :  { %v466_v61 = vor.u32 1.1754944e-38, %v465_v54  ;;  %vm464_vm6 = vcmp.eq.f32.partialorder %v463_v56, 8.507059e+37 }
 0x783   :  { %v1130_v44 = vpop.eup %1129 }
 0x784   :  { %v1132_v45 = vpop.eup %1131  ;;  %v440_v47 = vmul.f32 %v1130_v44, %v437_v42  ;;  %vm445_vm15 = vweird.f32 %v1130_v44 }
 0x785   :  { %v455_v46 = vmul.f32 %v1132_v45, %v438_v43  ;;  %vm460_vm0 = vweird.f32 %v1132_v45  ;;  %vm446_vm4 = vmor %vm444_vm2, %vm445_vm15 }
 0x786   :  { %v441_v49 = vsub.f32 1.0, %v440_v47  ;;  %vm461_vm5 = vmor %vm459_vm3, %vm460_vm0  ;;  %vm1008_vm3 = vcmask 1043456  }
 0x787   :  { %v456_v48 = vsub.f32 1.0, %v455_v46 }
 0x788   :  { %v442_v51 = vmul.f32 %v1130_v44, %v441_v49 }
 0x789   :  { %v457_v50 = vmul.f32 %v1132_v45, %v456_v48 }
 0x78a   :  { %v443_v53 = vadd.f32 %v1130_v44, %v442_v51 }
 0x78b   :  { %v458_v52 = vadd.f32 %v1132_v45, %v457_v50 }
 0x78c   :  { %v447_v59 = vsel %vm446_vm4, %v1130_v44, %v443_v53 }
 0x78d   :  { %v462_v58 = vsel %vm461_vm5, %v1132_v45, %v458_v52  ;;  %v452_v2 = vsel %vm449_vm7, %v451_v62, %v447_v59 }
 0x78e   :  { %v467_v15 = vsel %vm464_vm6, %v466_v61, %v462_v58  ;;  %v493_v13 = vsub.f32 1.0, %v452_v2  ;;  %v515_v58 = vld [vmem:[%s1487_s0] sm:$0x4] }
 0x78f   :  { %v494_v20 = vsub.f32 1.0, %v467_v15  ;;  %v512_v60 = vmul.f32 %v508_v21, %v467_v15  ;;  %v1369_v59 = vunpack.c.l.bf16 %v515_v58 }
 0x7e4   :  { %v476_v63 = vpop.permute.xlu1 %475  ;;  %v474_v0 = vpop.permute.xlu0 %473 }
 0x7e5   :  { %v480_v3 = vmul.f32 %v476_v63, %v467_v15  ;;  %v479_v14 = vmul.f32 %v474_v0, %v452_v2 }
 0x7e7   :  { %485 = vrot.lane.b32.xlu0 %v480_v3, %s1186_s18  ;;  %483 = vrot.lane.b32.xlu2 %v479_v14, %s1186_s18 }
 0x841   :  { %v484_v7 = vpop.permute.xlu2 %483 }
 0x842   :  { %v489_v8 = vadd.f32 %v484_v7, %v1289_v17  ;;  %v511_v17 = vmul.f32 %v507_v18, %v452_v2 }
 0x844   :  { %1133 = vtanh.f32 %v489_v8 }
 0x84a   :  { %v1134_v9 = vpop.eup %1133 }
 0x84b   :  { %497 = vrot.lane.b32.xlu1 %v1134_v9, %s1188_s22 }
 0x859   :  { %v486_v10 = vpop.permute.xlu0 %485 }
 0x85a   :  { %v490_v11 = vadd.f32 %v486_v10, %v1299_v41 }
 0x85c   :  { %1135 = vtanh.f32 %v490_v11 }
 0x862   :  { %v1136_v12 = vpop.eup %1135 }
 0x863   :  { %499 = vrot.lane.b32.xlu2 %v1136_v12, %s1188_s22 }
 0x8bd   :  { %v498_v23 = vpop.permute.xlu1 %497  ;;  %v500_v25 = vpop.permute.xlu2 %499 }
 0x8be   :  { %v503_v26 = vmul.f32 %v498_v23, %v493_v13  ;;  %v504_v1 = vmul.f32 %v500_v25, %v494_v20 }
 0x8c0   :  { %v1343_v27 = vadd.f32 %v511_v17, %v503_v26  ;;  %v514_v41 = vadd.f32 %v512_v60, %v504_v1 }
 0x8c2   :  { %v519_v28 = vpack.c.bf16 %v1343_v27, %v1343_v27  ;;  %v1349_v5 = vsel %vm1005_vm8, %v1325_v24, %v1343_v27  ;;  %v520_v19 = vpack.c.bf16 %v514_v41, %v514_v41  ;;  %v1352_v16 = vsel %vm1005_vm8, %v1320_v22, %v514_v41  ;;  %v516_v24 = vld [vmem:[%s1487_s0 + $0x4] sm:$0x4] }
 0x8c3   :  { %v1360_v35 = vunpack.c.l.bf16 %v516_v24  ;;  %v631_v55 = vrot.slane %v514_v41, 7 }
 0x8c4   :  { %v523_v4 = vunpack.c.l.b16 %v519_v28  ;;  %v524_v29 = vunpack.c.l.b16 %v520_v19  ;;  %v630_v19 = vrot.slane %v1343_v27, 7 }
 0x8c6   :  { %v525_v30 = vrot.slane %v523_v4, 3  ;;  %v526_v31 = vrot.slane %v524_v29, 2 }
 0x8c8   :  { %v527_v32 = vsel %vm164_vm10, %v526_v31, %v525_v30 }
 0x8c9   :  { %v528_v33 = vpack.c.b16 %v527_v32, %v527_v32 }
 0x8cb   :  { %529 = vrot.lane.b32.xlu0 %v528_v33, %s1188_s22 }
 0x93d   :  { %v530_v34 = vpop.permute.xlu0 %529 }
 0x93e   :  { %1070 = vmatmul.msk.bf16.vlgmr.msrb.gmra.mxu0 %vm46_vm1, %v530_v34 }
 0x9bb   :  { %v543_v22 = vpop.f32.mrf.mxu0 }
 0x9bc   :  { %v549_v36 = vrot.slane %v543_v22, 5  ;;  %v592_v37 = vadd.f32 %v543_v22, %v1224_v6  ;;  %v548_v61 = vrot.slane %v543_v22, 4 }
 0x9be   :  { %v553_v38 = vadd.f32 %v549_v36, %v1360_v35  ;;  %v595_v39 = vrot.slane %v592_v37, 5  ;;  %v594_v40 = vrot.slane %v592_v37, 4  ;;  %v552_v62 = vadd.f32 %v548_v61, %v1369_v59 }
 0x9c0   :  { %v1072_v42 = vmul.f32 -1.442695, %v553_v38  ;;  %598 = vrot.lane.b32.xlu2 %v595_v39, %s1186_s18  ;;  %596 = vrot.lane.b32.xlu1 %v594_v40, %s1186_s18  ;;  %v1071_v63 = vmul.f32 -1.442695, %v552_v62 }
 0x9c2   :  { %1137 = vpow2.f32 %v1072_v42 }
 0x9c3   :  { %v545_v43 = vpop.f32.mrf.mxu0 }
 0x9c8   :  { %v1138_v44 = vpop.eup %1137 }
 0x9c9   :  { %v561_v45 = vadd.f32 1.0, %v1138_v44 }
 0x9cb   :  { %1139 = vrcp.f32 %v561_v45  ;;  %v588_v49 = vand.u32 2147483648, %v561_v45  ;;  %v586_v51 = vand.u32 2147483647, %v561_v45  ;;  %vm582_vm11 = vweird.f32 %v561_v45 }
 0x9cc   :  { %1141 = vpow2.f32 %v1071_v63 }
 0x9cd   :  { %v589_v53 = vor.u32 1.1754944e-38, %v588_v49  ;;  %vm587_vm13 = vcmp.eq.f32.partialorder %v586_v51, 8.507059e+37 }
 0x9d1   :  { %v1140_v46 = vpop.eup %1139 }
 0x9d2   :  { %v578_v47 = vmul.f32 %v1140_v46, %v561_v45  ;;  %vm583_vm9 = vweird.f32 %v1140_v46  ;;  %v1142_v15 = vpop.eup %1141 }
 0x9d3   :  { %vm584_vm12 = vmor %vm582_vm11, %vm583_vm9  ;;  %v560_v0 = vadd.f32 1.0, %v1142_v15 }
 0x9d4   :  { %v579_v48 = vsub.f32 1.0, %v578_v47 }
 0x9d5   :  { %1143 = vrcp.f32 %v560_v0  ;;  %v573_v11 = vand.u32 2147483648, %v560_v0  ;;  %vm567_vm15 = vweird.f32 %v560_v0  ;;  %v571_v12 = vand.u32 2147483647, %v560_v0 }
 0x9d6   :  { %v580_v50 = vmul.f32 %v1140_v46, %v579_v48 }
 0x9d7   :  { %v574_v18 = vor.u32 1.1754944e-38, %v573_v11  ;;  %vm572_vm2 = vcmp.eq.f32.partialorder %v571_v12, 8.507059e+37 }
 0x9d8   :  { %v581_v52 = vadd.f32 %v1140_v46, %v580_v50 }
 0x9da   :  { %v585_v54 = vsel %vm584_vm12, %v1140_v46, %v581_v52 }
 0x9db   :  { %v590_v56 = vsel %vm587_vm13, %v589_v53, %v585_v54  ;;  %v1144_v14 = vpop.eup %1143  ;;  %vm1011_vm13 = vcmask 1044480  }
 0x9dc   :  { %v635_v57 = vmul.f32 %v631_v55, %v590_v56  ;;  %v563_v7 = vmul.f32 %v1144_v14, %v560_v0  ;;  %vm568_vm14 = vweird.f32 %v1144_v14  ;;  %v617_v4 = vsub.f32 1.0, %v590_v56 }
 0x9dd   :  { %vm569_vm0 = vmor %vm567_vm15, %vm568_vm14 }
 0x9de   :  { %v564_v8 = vsub.f32 1.0, %v563_v7 }
 0x9e0   :  { %v565_v9 = vmul.f32 %v1144_v14, %v564_v8 }
 0x9e2   :  { %v566_v10 = vadd.f32 %v1144_v14, %v565_v9 }
 0x9e4   :  { %v570_v13 = vsel %vm569_vm0, %v1144_v14, %v566_v10 }
 0x9e5   :  { %v575_v21 = vsel %vm572_vm2, %v574_v18, %v570_v13 }
 0x9e6   :  { %v616_v28 = vsub.f32 1.0, %v575_v21  ;;  %v634_v31 = vmul.f32 %v630_v19, %v575_v21 }
 0xa1a   :  { %v599_v2 = vpop.permute.xlu2 %598 }
 0xa1b   :  { %v603_v3 = vmul.f32 %v599_v2, %v590_v56 }
 0xa1d   :  { %608 = vrot.lane.b32.xlu1 %v603_v3, %s1186_s18 }
 0xa32   :  { %v597_v20 = vpop.permute.xlu1 %596 }
 0xa33   :  { %v602_v23 = vmul.f32 %v597_v20, %v575_v21 }
 0xa35   :  { %606 = vrot.lane.b32.xlu0 %v602_v23, %s1186_s18 }
 0xa8f   :  { %v609_v25 = vpop.permute.xlu1 %608 }
 0xa90   :  { %v613_v17 = vadd.f32 %v609_v25, %v1360_v35 }
 0xa92   :  { %1145 = vtanh.f32 %v613_v17 }
 0xa98   :  { %v1146_v26 = vpop.eup %1145 }
 0xa99   :  { %622 = vrot.lane.b32.xlu0 %v1146_v26, %s1188_s22 }
 0xaa7   :  { %v607_v60 = vpop.permute.xlu0 %606 }
 0xaa8   :  { %v612_v1 = vadd.f32 %v607_v60, %v1369_v59 }
 0xaaa   :  { %1147 = vtanh.f32 %v612_v1 }
 0xab0   :  { %v1148_v41 = vpop.eup %1147 }
 0xab1   :  { %620 = vrot.lane.b32.xlu2 %v1148_v41, %s1188_s22 }
 0xb0b   :  { %v621_v29 = vpop.permute.xlu2 %620  ;;  %v623_v30 = vpop.permute.xlu0 %622 }
 0xb0c   :  { %v626_v32 = vmul.f32 %v621_v29, %v616_v28  ;;  %v627_v33 = vmul.f32 %v623_v30, %v617_v4 }
 0xb0e   :  { %v636_v34 = vadd.f32 %v634_v31, %v626_v32  ;;  %v1379_v24 = vadd.f32 %v635_v57, %v627_v33 }
 0xb10   :  { %v638_v22 = vpack.c.bf16 %v636_v34, %v636_v34  ;;  %v1382_v36 = vsel %vm1008_vm3, %v1349_v5, %v636_v34  ;;  %v639_v37 = vpack.c.bf16 %v1379_v24, %v1379_v24  ;;  %v1388_v27 = vsel %vm1008_vm3, %v1352_v16, %v1379_v24 }
 0xb11   :  { %v749_v0 = vrot.slane %v636_v34, 7  ;;  %v750_v34 = vrot.slane %v1379_v24, 7 }
 0xb12   :  { %v642_v38 = vunpack.c.l.b16 %v638_v22  ;;  %v643_v39 = vunpack.c.l.b16 %v639_v37 }
 0xb14   :  { %v644_v40 = vrot.slane %v642_v38, 4  ;;  %v645_v42 = vrot.slane %v643_v39, 3 }
 0xb16   :  { %v646_v43 = vsel %vm164_vm10, %v645_v42, %v644_v40 }
 0xb17   :  { %v647_v44 = vpack.c.b16 %v646_v43, %v646_v43 }
 0xb19   :  { %648 = vrot.lane.b32.xlu1 %v647_v44, %s1188_s22 }
 0xb8b   :  { %v649_v45 = vpop.permute.xlu1 %648 }
 0xb8c   :  { %1073 = vmatmul.msk.bf16.vlgmr.msrb.gmra.mxu1 %vm46_vm1, %v649_v45 }
 0xc09   :  { %v662_v5 = vpop.f32.mrf.mxu1 }
 0xc0a   :  { %v667_v46 = vrot.slane %v662_v5, 3  ;;  %v711_v47 = vadd.f32 %v662_v5, %v1224_v6  ;;  %v668_v14 = vrot.slane %v662_v5, 4 }
 0xc0c   :  { %v671_v48 = vadd.f32 %v667_v46, %v1369_v59  ;;  %v714_v16 = vrot.slane %v711_v47, 4  ;;  %v713_v49 = vrot.slane %v711_v47, 3  ;;  %v672_v7 = vadd.f32 %v668_v14, %v1360_v35 }
 0xc0e   :  { %v1074_v50 = vmul.f32 -1.442695, %v671_v48  ;;  %717 = vrot.lane.b32.xlu0 %v714_v16, %s1186_s18  ;;  %715 = vrot.lane.b32.xlu2 %v713_v49, %s1186_s18  ;;  %v1075_v8 = vmul.f32 -1.442695, %v672_v7 }
 0xc10   :  { %1149 = vpow2.f32 %v1074_v50 }
 0xc11   :  { %v664_v51 = vpop.f32.mrf.mxu1 }
 0xc16   :  { %v1150_v52 = vpop.eup %1149 }
 0xc17   :  { %v679_v53 = vadd.f32 1.0, %v1150_v52 }
 0xc19   :  { %1151 = vrcp.f32 %v679_v53  ;;  %v692_v57 = vand.u32 2147483648, %v679_v53  ;;  %v690_v61 = vand.u32 2147483647, %v679_v53  ;;  %vm686_vm5 = vweird.f32 %v679_v53 }
 0xc1a   :  { %1153 = vpow2.f32 %v1075_v8 }
 0xc1b   :  { %v693_v63 = vor.u32 1.1754944e-38, %v692_v57  ;;  %vm691_vm7 = vcmp.eq.f32.partialorder %v690_v61, 8.507059e+37 }
 0xc1f   :  { %v1152_v54 = vpop.eup %1151 }
 0xc20   :  { %v682_v55 = vmul.f32 %v1152_v54, %v679_v53  ;;  %vm687_vm4 = vweird.f32 %v1152_v54  ;;  %v1154_v9 = vpop.eup %1153 }
 0xc21   :  { %vm688_vm6 = vmor %vm686_vm5, %vm687_vm4  ;;  %v680_v10 = vadd.f32 1.0, %v1154_v9 }
 0xc22   :  { %v683_v56 = vsub.f32 1.0, %v682_v55  ;;  %v758_v55 = vld [vmem:[%s1487_s0 + $0x4] sm:$0x8] }
 0xc23   :  { %1155 = vrcp.f32 %v680_v10  ;;  %v707_v25 = vand.u32 2147483648, %v680_v10  ;;  %vm701_vm9 = vweird.f32 %v680_v10  ;;  %v705_v17 = vand.u32 2147483647, %v680_v10 }
 0xc24   :  { %v684_v58 = vmul.f32 %v1152_v54, %v683_v56 }
 0xc25   :  { %v708_v60 = vor.u32 1.1754944e-38, %v707_v25  ;;  %vm706_vm12 = vcmp.eq.f32.partialorder %v705_v17, 8.507059e+37 }
 0xc26   :  { %v685_v62 = vadd.f32 %v1152_v54, %v684_v58  ;;  %v1435_v58 = vunpack.c.l.bf16 %v758_v55 }
 0xc28   :  { %v689_v15 = vsel %vm688_vm6, %v1152_v54, %v685_v62  ;;  %v757_v54 = vld [vmem:[%s1487_s0] sm:$0x8] }
 0xc29   :  { %v694_v2 = vsel %vm691_vm7, %v693_v63, %v689_v15  ;;  %v1156_v13 = vpop.eup %1155  ;;  %v1433_v56 = vunpack.c.l.bf16 %v757_v54  ;;  %vm1014_vm7 = vcmask 1045504  }
 0xc2a   :  { %v753_v3 = vmul.f32 %v749_v0, %v694_v2  ;;  %v697_v18 = vmul.f32 %v1156_v13, %v680_v10  ;;  %vm702_vm8 = vweird.f32 %v1156_v13  ;;  %v735_v22 = vsub.f32 1.0, %v694_v2 }
 0xc2b   :  { %vm703_vm11 = vmor %vm701_vm9, %vm702_vm8 }
 0xc2c   :  { %v698_v20 = vsub.f32 1.0, %v697_v18 }
 0xc2e   :  { %v699_v21 = vmul.f32 %v1156_v13, %v698_v20 }
 0xc30   :  { %v700_v23 = vadd.f32 %v1156_v13, %v699_v21 }
 0xc32   :  { %v704_v26 = vsel %vm703_vm11, %v1156_v13, %v700_v23 }
 0xc33   :  { %v709_v41 = vsel %vm706_vm12, %v708_v60, %v704_v26 }
 0xc34   :  { %v736_v33 = vsub.f32 1.0, %v709_v41  ;;  %v754_v39 = vmul.f32 %v750_v34, %v709_v41 }
 0xc68   :  { %v716_v11 = vpop.permute.xlu2 %715 }
 0xc69   :  { %v721_v12 = vmul.f32 %v716_v11, %v694_v2 }
 0xc6b   :  { %725 = vrot.lane.b32.xlu1 %v721_v12, %s1186_s18 }
 0xc80   :  { %v718_v1 = vpop.permute.xlu0 %717 }
 0xc81   :  { %v722_v28 = vmul.f32 %v718_v1, %v709_v41 }
 0xc83   :  { %727 = vrot.lane.b32.xlu2 %v722_v28, %s1186_s18 }
 0xcdd   :  { %v728_v19 = vpop.permute.xlu2 %727  ;;  %v726_v4 = vpop.permute.xlu1 %725 }
 0xcde   :  { %v732_v29 = vadd.f32 %v728_v19, %v1360_v35  ;;  %v731_v30 = vadd.f32 %v726_v4, %v1369_v59 }
 0xce0   :  { %1157 = vtanh.f32 %v732_v29 }
 0xce1   :  { %1159 = vtanh.f32 %v731_v30 }
 0xce6   :  { %v1158_v31 = vpop.eup %1157 }
 0xce7   :  { %v1160_v32 = vpop.eup %1159  ;;  %741 = vrot.lane.b32.xlu1 %v1158_v31, %s1188_s22 }
 0xce8   :  { %739 = vrot.lane.b32.xlu0 %v1160_v32, %s1188_s22 }
 0xd59   :  { %v742_v37 = vpop.permute.xlu1 %741 }
 0xd5a   :  { %v740_v38 = vpop.permute.xlu0 %739  ;;  %v746_v40 = vmul.f32 %v742_v37, %v736_v33 }
 0xd5b   :  { %v745_v35 = vmul.f32 %v740_v38, %v735_v22 }
 0xd5c   :  { %v1405_v42 = vadd.f32 %v754_v39, %v746_v40 }
 0xd5d   :  { %v1407_v59 = vadd.f32 %v753_v3, %v745_v35 }
 0xd5e   :  { %v762_v43 = vpack.c.bf16 %v1405_v42, %v1405_v42  ;;  %v1413_v44 = vsel %vm1011_vm13, %v1388_v27, %v1405_v42 }
 0xd5f   :  { %v761_v24 = vpack.c.bf16 %v1407_v59, %v1407_v59  ;;  %v1419_v45 = vsel %vm1011_vm13, %v1382_v36, %v1407_v59 }
 0xd60   :  { %v766_v5 = vunpack.c.l.b16 %v762_v43  ;;  %v872_v43 = vrot.slane %v1407_v59, 7 }
 0xd61   :  { %v765_v46 = vunpack.c.l.b16 %v761_v24 }
 0xd62   :  { %v768_v47 = vrot.slane %v766_v5, 4  ;;  %v873_v5 = vrot.slane %v1405_v42, 7 }
 0xd63   :  { %v767_v48 = vrot.slane %v765_v46, 5 }
 0xd65   :  { %v769_v16 = vsel %vm164_vm10, %v768_v47, %v767_v48 }
 0xd66   :  { %v770_v49 = vpack.c.b16 %v769_v16, %v769_v16 }
 0xd68   :  { %771 = vrot.lane.b32.xlu2 %v770_v49, %s1188_s22 }
 0xdc2   :  { %v772_v50 = vpop.permute.xlu2 %771 }
 0xdc3   :  { %1076 = vmatmul.msk.bf16.vlgmr.msrb.gmra.mxu2 %vm46_vm1, %v772_v50 }
 0xe46   :  { %v785_v27 = vpop.f32.mrf.mxu2 }
 0xe47   :  { %v834_v51 = vadd.f32 %v785_v27, %v1224_v6  ;;  %v790_v57 = vrot.slane %v785_v27, 2  ;;  %v791_v61 = vrot.slane %v785_v27, 3 }
 0xe49   :  { %v837_v52 = vrot.slane %v834_v51, 3  ;;  %v836_v53 = vrot.slane %v834_v51, 2  ;;  %v794_v62 = vadd.f32 %v790_v57, %v1433_v56  ;;  %v795_v63 = vadd.f32 %v791_v61, %v1435_v58 }
 0xe4b   :  { %840 = vrot.lane.b32.xlu1 %v837_v52, %s1186_s18  ;;  %838 = vrot.lane.b32.xlu0 %v836_v53, %s1186_s18  ;;  %v1077_v15 = vmul.f32 -1.442695, %v794_v62  ;;  %v1078_v0 = vmul.f32 -1.442695, %v795_v63 }
 0xe4d   :  { %1161 = vpow2.f32 %v1077_v15 }
 0xe4e   :  { %v787_v36 = vpop.f32.mrf.mxu2  ;;  %1163 = vpow2.f32 %v1078_v0 }
 0xe53   :  { %v1162_v2 = vpop.eup %1161 }
 0xe54   :  { %v1164_v3 = vpop.eup %1163  ;;  %v802_v14 = vadd.f32 1.0, %v1162_v2 }
 0xe55   :  { %v803_v7 = vadd.f32 1.0, %v1164_v3 }
 0xe56   :  { %1165 = vrcp.f32 %v802_v14  ;;  %vm809_vm0 = vweird.f32 %v802_v14  ;;  %v815_v17 = vand.u32 2147483648, %v802_v14  ;;  %v813_v60 = vand.u32 2147483647, %v802_v14 }
 0xe57   :  { %1167 = vrcp.f32 %v803_v7  ;;  %v830_v25 = vand.u32 2147483648, %v803_v7  ;;  %vm824_vm2 = vweird.f32 %v803_v7  ;;  %v828_v26 = vand.u32 2147483647, %v803_v7 }
 0xe58   :  { %v816_v19 = vor.u32 1.1754944e-38, %v815_v17  ;;  %vm814_vm6 = vcmp.eq.f32.partialorder %v813_v60, 8.507059e+37 }
 0xe59   :  { %v831_v28 = vor.u32 1.1754944e-38, %v830_v25  ;;  %vm829_vm5 = vcmp.eq.f32.partialorder %v828_v26, 8.507059e+37 }
 0xe5c   :  { %v1166_v8 = vpop.eup %1165 }
 0xe5d   :  { %v1168_v9 = vpop.eup %1167  ;;  %v805_v11 = vmul.f32 %v1166_v8, %v802_v14  ;;  %vm810_vm14 = vweird.f32 %v1166_v8 }
 0xe5e   :  { %v820_v10 = vmul.f32 %v1168_v9, %v803_v7  ;;  %vm825_vm15 = vweird.f32 %v1168_v9  ;;  %vm811_vm3 = vmor %vm809_vm0, %vm810_vm14  ;;  %vm1030_vm0 = vcmask 257024  }
 0xe5f   :  { %v806_v13 = vsub.f32 1.0, %v805_v11  ;;  %vm826_vm4 = vmor %vm824_vm2, %vm825_vm15  ;;  %vm1017_vm15 = vcmask 1046528   ;;  %vm1042_vm2 = vcmask 261127  }
 0xe60   :  { %v821_v12 = vsub.f32 1.0, %v820_v10 }
 0xe61   :  { %v807_v20 = vmul.f32 %v1166_v8, %v806_v13 }
 0xe62   :  { %v822_v18 = vmul.f32 %v1168_v9, %v821_v12 }
 0xe63   :  { %v808_v23 = vadd.f32 %v1166_v8, %v807_v20 }
 0xe64   :  { %v823_v21 = vadd.f32 %v1168_v9, %v822_v18 }
 0xe65   :  { %v812_v41 = vsel %vm811_vm3, %v1166_v8, %v808_v23  ;;  %vm1044_vm3 = vcmask 253952  }
 0xe66   :  { %v827_v1 = vsel %vm826_vm4, %v1168_v9, %v823_v21  ;;  %v817_v31 = vsel %vm814_vm6, %v816_v19, %v812_v41 }
 0xe67   :  { %v832_v29 = vsel %vm829_vm5, %v831_v28, %v827_v1  ;;  %v858_v35 = vsub.f32 1.0, %v817_v31  ;;  %v876_v48 = vmul.f32 %v872_v43, %v817_v31 }
 0xe68   :  { %v859_v24 = vsub.f32 1.0, %v832_v29  ;;  %v877_v49 = vmul.f32 %v873_v5, %v832_v29 }
 0xebd   :  { %v841_v4 = vpop.permute.xlu1 %840  ;;  %v839_v30 = vpop.permute.xlu0 %838 }
 0xebe   :  { %v845_v32 = vmul.f32 %v841_v4, %v832_v29  ;;  %v844_v33 = vmul.f32 %v839_v30, %v817_v31 }
 0xec0   :  { %850 = vrot.lane.b32.xlu0 %v845_v32, %s1186_s18  ;;  %848 = vrot.lane.b32.xlu2 %v844_v33, %s1186_s18 }
 0xf1a   :  { %v849_v34 = vpop.permute.xlu2 %848 }
 0xf1b   :  { %v854_v22 = vadd.f32 %v849_v34, %v1433_v56 }
 0xf1d   :  { %1169 = vtanh.f32 %v854_v22 }
 0xf23   :  { %v1170_v37 = vpop.eup %1169 }
 0xf24   :  { %862 = vrot.lane.b32.xlu1 %v1170_v37, %s1188_s22 }
 0xf32   :  { %v851_v38 = vpop.permute.xlu0 %850 }
 0xf33   :  { %v855_v39 = vadd.f32 %v851_v38, %v1435_v58 }
 0xf35   :  { %1171 = vtanh.f32 %v855_v39 }
 0xf3b   :  { %v1172_v40 = vpop.eup %1171 }
 0xf3c   :  { %864 = vrot.lane.b32.xlu2 %v1172_v40, %s1188_s22 }
 0xf96   :  { %v863_v46 = vpop.permute.xlu1 %862  ;;  %v865_v47 = vpop.permute.xlu2 %864 }
 0xf97   :  { %v868_v16 = vmul.f32 %v863_v46, %v858_v35  ;;  %v869_v50 = vmul.f32 %v865_v47, %v859_v24 }
 0xf99   :  { %v1447_v27 = vadd.f32 %v876_v48, %v868_v16  ;;  %v879_v51 = vadd.f32 %v877_v49, %v869_v50 }
 0xf9b   :  { %v880_v52 = vpack.c.bf16 %v1447_v27, %v1447_v27  ;;  %v881_v53 = vpack.c.bf16 %v879_v51, %v879_v51  ;;  %v1453_v59 = vsel %vm1014_vm7, %v1419_v45, %v1447_v27  ;;  %v1456_v42 = vsel %vm1014_vm7, %v1413_v44, %v879_v51 }
 0xf9c   :  { %v992_v25 = vrot.slane %v879_v51, 7  ;;  %v991_v50 = vrot.slane %v1447_v27, 7 }
 0xf9d   :  { %v884_v36 = vunpack.c.l.b16 %v880_v52  ;;  %v885_v54 = vunpack.c.l.b16 %v881_v53 }
 0xf9f   :  { %v886_v55 = vrot.slane %v884_v36, 6  ;;  %v887_v57 = vrot.slane %v885_v54, 5 }
 0xfa1   :  { %v888_v61 = vsel %vm164_vm10, %v887_v57, %v886_v55 }
 0xfa2   :  { %v889_v62 = vpack.c.b16 %v888_v61, %v888_v61 }
 0xfa4   :  { %890 = vrot.lane.b32.xlu0 %v889_v62, %s1188_s22 }
0x1016   :  { %v891_v63 = vpop.permute.xlu0 %890 }
0x1017   :  { %1079 = vmatmul.msk.bf16.vlgmr.msrb.gmra.mxu3 %vm46_vm1, %v891_v63 }
0x109a   :  { %v904_v15 = vpop.f32.mrf.mxu3 }
0x109b   :  { %v910_v0 = vrot.slane %v904_v15, 2  ;;  %v953_v45 = vadd.f32 %v904_v15, %v1224_v6  ;;  %v909_v60 = vrot.slane %v904_v15, 1 }
0x109d   :  { %v914_v2 = vadd.f32 %v910_v0, %v1435_v58  ;;  %v956_v44 = vrot.slane %v953_v45, 2  ;;  %v955_v3 = vrot.slane %v953_v45, 1  ;;  %v913_v1 = vadd.f32 %v909_v60, %v1433_v56 }
0x109f   :  { %v1081_v14 = vmul.f32 -1.442695, %v914_v2  ;;  %959 = vrot.lane.b32.xlu2 %v956_v44, %s1186_s18  ;;  %957 = vrot.lane.b32.xlu1 %v955_v3, %s1186_s18  ;;  %v1080_v41 = vmul.f32 -1.442695, %v913_v1 }
0x10a1   :  { %1173 = vpow2.f32 %v1081_v14 }
0x10a2   :  { %v906_v7 = vpop.f32.mrf.mxu3 }
0x10a7   :  { %v1174_v8 = vpop.eup %1173 }
0x10a8   :  { %v922_v9 = vadd.f32 1.0, %v1174_v8 }
0x10aa   :  { %1175 = vrcp.f32 %v922_v9  ;;  %v949_v13 = vand.u32 2147483648, %v922_v9  ;;  %v947_v6 = vand.u32 2147483647, %v922_v9  ;;  %vm943_vm10 = vweird.f32 %v922_v9 }
0x10ab   :  { %1177 = vpow2.f32 %v1080_v41 }
0x10ac   :  { %v950_v21 = vor.u32 1.1754944e-38, %v949_v13  ;;  %vm948_vm9 = vcmp.eq.f32.partialorder %v947_v6, 8.507059e+37 }
0x10b0   :  { %v1176_v10 = vpop.eup %1175 }
0x10b1   :  { %v939_v11 = vmul.f32 %v1176_v10, %v922_v9  ;;  %vm944_vm1 = vweird.f32 %v1176_v10  ;;  %v1178_v28 = vpop.eup %1177 }
0x10b2   :  { %vm945_vm8 = vmor %vm943_vm10, %vm944_vm1  ;;  %v921_v19 = vadd.f32 1.0, %v1178_v28 }
0x10b3   :  { %v940_v12 = vsub.f32 1.0, %v939_v11 }
0x10b4   :  { %1179 = vrcp.f32 %v921_v19  ;;  %v934_v22 = vand.u32 2147483648, %v921_v19  ;;  %vm928_vm12 = vweird.f32 %v921_v19  ;;  %v932_v37 = vand.u32 2147483647, %v921_v19 }
0x10b5   :  { %v941_v18 = vmul.f32 %v1176_v10, %v940_v12 }
0x10b6   :  { %v935_v39 = vor.u32 1.1754944e-38, %v934_v22  ;;  %vm933_vm14 = vcmp.eq.f32.partialorder %v932_v37, 8.507059e+37 }
0x10b7   :  { %v942_v20 = vadd.f32 %v1176_v10, %v941_v18 }
0x10b9   :  { %v946_v23 = vsel %vm945_vm8, %v1176_v10, %v942_v20 }
0x10ba   :  { %v951_v17 = vsel %vm948_vm9, %v950_v21, %v946_v23  ;;  %v1180_v30 = vpop.eup %1179 }
0x10bb   :  { %v996_v26 = vmul.f32 %v992_v25, %v951_v17  ;;  %v924_v31 = vmul.f32 %v1180_v30, %v921_v19  ;;  %vm929_vm11 = vweird.f32 %v1180_v30  ;;  %v978_v51 = vsub.f32 1.0, %v951_v17 }
0x10bc   :  { %vm930_vm13 = vmor %vm928_vm12, %vm929_vm11 }
0x10bd   :  { %v925_v32 = vsub.f32 1.0, %v924_v31 }
0x10bf   :  { %v926_v33 = vmul.f32 %v1180_v30, %v925_v32 }
0x10c1   :  { %v927_v34 = vadd.f32 %v1180_v30, %v926_v33 }
0x10c3   :  { %v931_v38 = vsel %vm930_vm13, %v1180_v30, %v927_v34 }
0x10c4   :  { %v936_v35 = vsel %vm933_vm14, %v935_v39, %v931_v38 }
0x10c5   :  { %v977_v49 = vsub.f32 1.0, %v936_v35  ;;  %v995_v36 = vmul.f32 %v991_v50, %v936_v35 }
0x10f9   :  { %v960_v4 = vpop.permute.xlu2 %959 }
0x10fa   :  { %v964_v29 = vmul.f32 %v960_v4, %v951_v17 }
0x10fc   :  { %969 = vrot.lane.b32.xlu1 %v964_v29, %s1186_s18 }
0x1111   :  { %v958_v40 = vpop.permute.xlu1 %957 }
0x1112   :  { %v963_v43 = vmul.f32 %v958_v40, %v936_v35 }
0x1114   :  { %967 = vrot.lane.b32.xlu0 %v963_v43, %s1186_s18 }
0x116e   :  { %v970_v24 = vpop.permute.xlu1 %969 }
0x116f   :  { %v974_v5 = vadd.f32 %v970_v24, %v1435_v58 }
0x1171   :  { %1181 = vtanh.f32 %v974_v5 }
0x1177   :  { %v1182_v46 = vpop.eup %1181 }
0x1178   :  { %983 = vrot.lane.b32.xlu0 %v1182_v46, %s1188_s22 }
0x1186   :  { %v968_v47 = vpop.permute.xlu0 %967 }
0x1187   :  { %v973_v48 = vadd.f32 %v968_v47, %v1433_v56 }
0x1189   :  { %1183 = vtanh.f32 %v973_v48 }
0x118f   :  { %v1184_v16 = vpop.eup %1183 }
0x1190   :  { %981 = vrot.lane.b32.xlu2 %v1184_v16, %s1188_s22 }
0x11ea   :  { %v982_v52 = vpop.permute.xlu2 %981  ;;  %v984_v53 = vpop.permute.xlu0 %983 }
0x11eb   :  { %v987_v54 = vmul.f32 %v982_v52, %v977_v49  ;;  %v988_v58 = vmul.f32 %v984_v53, %v978_v51 }
0x11ed   :  { %v997_v55 = vadd.f32 %v995_v36, %v987_v54  ;;  %v998_v57 = vadd.f32 %v996_v26, %v988_v58 }
0x11ef   :  { %1036 = vrot.lane.b32.xlu0 %v997_v55, %s1188_s22  ;;  %v1018_v56 = vsel %vm1017_vm15, %v1453_v59, %v997_v55  ;;  %v1019_v61 = vsel %vm1017_vm15, %v1456_v42, %v998_v57  ;;  %v1035_v27 = vrot.slane %v998_v57, 7 }
0x11f0   :  { %v1020_v62 = vpack.c.bf16 %v1018_v56, %v1018_v56  ;;  %v1021_v63 = vpack.c.bf16 %v1019_v61, %v1019_v61 }
0x11f2   :  { %1024 = vrot.lane.b32.xlu1 %v1020_v62, %s1188_s22  ;;  %1026 = vrot.lane.b32.xlu2 %v1021_v63, %s1188_s22 }
0x11fa   :  { %1038 = vrot.lane.b32.xlu1 %v1035_v27, %s1188_s22 }
0x124c   :  { %v1027_v15 = vpop.permute.xlu2 %1026 }
0x124d   :  { %1032 = vst.msk [vmem:[%s1488_s3 + $0x4] sm:$0xf] %vm1030_vm0, %v1027_v15 }
0x1261   :  { %v1037_v0 = vpop.permute.xlu0 %1036 }
0x1262   :  { %1043 = vst.msk [vmem:[#allocation2 - $0x7] sm:$0x80] %vm1042_vm2, %v1037_v0 }
0x1264   :  { %v1025_v59 = vpop.permute.xlu1 %1024 }
0x1265   :  { %1031 = vst.msk [vmem:[%s1488_s3] sm:$0xf] %vm1030_vm0, %v1025_v59 }
0x126c   :  { %v1039_v42 = vpop.permute.xlu1 %1038 }
0x126d   :  { %1045 = vst.msk [vmem:[#allocation2 + $0x1] sm:$0x1] %vm1044_vm3, %v1039_v42 }

</bundles_post_ra>
